<compile_context>
chip_gen: v5e
topology: v5e:2x2
jax: 0.10.0
libtpu: 0.0.40
codegen_flags: <defaults>
</compile_context>

<pallas_src>
import math
import numpy as np
import jax
import jax.numpy as jnp
from jax.experimental import pallas as pl
from jax.experimental.pallas import tpu as pltpu


# ----------------------------------------------------------------------------
# Host-side minimal tree + node_embedding (mirrors GNNModel.node_embedding).
# ----------------------------------------------------------------------------
class _Node:
    def __init__(self, name, children=None):
        self.name = name
        self.children = children or []
        self.up = None
        for c in self.children:
            c.up = self

    def is_leaf(self):
        return len(self.children) == 0

    def is_root(self):
        return self.up is None

    def postorder(self):
        for c in self.children:
            yield from c.postorder()
        yield self

    def preorder(self):
        yield self
        for c in self.children:
            yield from c.preorder()


def build_caterpillar_tree(ntips, leaf_names=None):
    """Binary tree with a trifurcating root: ntips leaves, ntips-2 internal
    nodes (names ntips..2*ntips-3, root last). `leaf_names` permutes which
    taxon sits at which position, giving distinct topologies per batch item."""
    if leaf_names is None:
        leaf_names = list(range(ntips))
    leaves = [_Node(int(leaf_names[i])) for i in range(ntips)]
    name = ntips
    cur = _Node(name, [leaves[ntips - 2], leaves[ntips - 1]])
    name += 1
    for leaf_idx in range(ntips - 3, 1, -1):
        cur = _Node(name, [leaves[leaf_idx], cur])
        name += 1
    root = _Node(name, [leaves[0], leaves[1], cur])
    return root


def node_embedding(tree, ntips):
    """Two-pass phylogenetic node embedding, identical math to the PyTorch
    reference (postorder c/d recursion, preorder correction, sort by name)."""
    leaf_features = np.eye(ntips, dtype=np.float32)
    for node in tree.postorder():
        if node.is_leaf():
            node.c = 0.0
            node.d = leaf_features[node.name].copy()
        else:
            child_c, child_d = 0.0, 0.0
            for child in node.children:
                child_c = child_c + child.c
                child_d = child_d + child.d
            node.c = 1.0 / (3.0 - child_c)
            node.d = node.c * child_d

    node_features, node_idx_list, edge_index = [], [], []
    for node in tree.preorder():
        neigh = []
        if not node.is_root():
            node.d = node.c * node.up.d + node.d
            neigh.append(node.up.name)
            if not node.is_leaf():
                neigh.extend([c.name for c in node.children])
            else:
                neigh.extend([-1, -1])
        else:
            neigh.extend([c.name for c in node.children])
        edge_index.append(neigh)
        node_features.append(node.d)
        node_idx_list.append(node.name)

    order = np.argsort(np.asarray(node_idx_list), kind="stable")
    node_features = np.stack(node_features, axis=0)[order].astype(np.float32)
    edge_index = np.asarray(edge_index, dtype=np.int32)[order]
    return node_features, edge_index


def edge_index_to_adjacency_np(edge_index, num_nodes):
    """(N,3) neighbor lists with -1 padding -> dense (N,N) 0/1 adjacency.
    Pure numpy, precomputed once per topology (no per-call device scatter)."""
    adj = np.zeros((num_nodes, num_nodes), dtype=np.float32)
    for i in range(num_nodes):
        for j in edge_index[i]:
            if j >= 0:
                adj[i, int(j)] += 1.0
    return adj


# ----------------------------------------------------------------------------
# Pallas kernel: fused GCN layer + graph pooling + 2-layer MLP head, batched.
# ----------------------------------------------------------------------------
def _elu(x):
    # Safe ELU: exp only sees non-positive inputs (no overflow on the dead branch).
    return jnp.where(x > 0, x, jnp.exp(jnp.minimum(x, 0.0)) - 1.0)


def gnn_batched_kernel(x_ref, adj_ref, pool_ref, w_ref, b_ref, out_ref):
    # x_ref   : (TBN, Fp)      bf16  node features, TB trees stacked row-wise (padded)
    # adj_ref : (TBN, TBN)     f32   block-diagonal 0/1 adjacency (tile axis squeezed)
    # pool_ref: (TB, TBN)      f32   0/1 sum-pooling matrix (real node rows only)
    # w_ref   : (Fp+2H, H)     bf16  [w1_pad | wp1 | wp2_pad] slab, 16-row aligned
    # b_ref   : (3, H)         f32   [b1 ; bp1 ; bp2_pad]
    # out_ref : (TB, H)        f32   scalar output per tree in column 0
    Fp = x_ref.shape[1]
    H = w_ref.shape[1]

    # bf16 slab, 16-row (sublane-pack) aligned static slices -> no per-step casts.
    w1 = w_ref[0:Fp, :]                      # (Fp, H)
    wp1 = w_ref[Fp:Fp + H, :]                # (H, H)
    wp2 = w_ref[Fp + H:Fp + 2 * H, :]        # (H, H) (col 0 real)
    b1 = b_ref[0:1, :]
    bp1 = b_ref[1:2, :]
    bp2 = b_ref[2:3, :]

    # --- GCNConv (aggr='sum', bias=True): linear first, then self + neighbor sum.
    # bf16 MXU for the feature lift, then f32 MXU for the aggregation (no bf16
    # round-trip of h, matching the f32 PyTorch GCNConv more closely).
    h = jnp.dot(x_ref[...], w1, preferred_element_type=jnp.float32) + b1   # (TBN, H)
    h = h + jnp.dot(adj_ref[...], h, preferred_element_type=jnp.float32)   # + A @ h
    h = _elu(h)                                                            # GNNStack ELU

    # --- GraphPooling (sum over each tree's real nodes, as an f32 matmul) + MLP head
    g = jnp.dot(pool_ref[...], h, preferred_element_type=jnp.float32)      # (TB, H)
    z = _elu(jnp.dot(g.astype(jnp.bfloat16), wp1,
                     preferred_element_type=jnp.float32) + bp1)             # (TB, H)
    out_ref[...] = jnp.dot(z.astype(jnp.bfloat16), wp2,
                           preferred_element_type=jnp.float32) + bp2        # (TB, H)


def gnn_model_forward_batched(x_flat, adj_blockdiag, pool_mat, w_slab, b_slab,
                              *, nodes_pad, tile_b):
    """x_flat: (B*Np, Fp) bf16; adj_blockdiag: (B//TB, TB*Np, TB*Np) f32;
    pool_mat: (TB, TB*Np) f32; w_slab: (Fp+2H, H) bf16; b_slab: (3, H) f32.
    Returns (B, 1) f32 — one scalar per tree (pooling-net output)."""
    tbn = tile_b * nodes_pad
    total_rows, feat_pad = x_flat.shape
    batch = total_rows // nodes_pad
    assert batch % tile_b == 0
    num_tiles = batch // tile_b
    hidden = w_slab.shape[1]

    out_pad = pl.pallas_call(
        gnn_batched_kernel,
        out_shape=jax.ShapeDtypeStruct((batch, hidden), jnp.float32),
        grid=(num_tiles,),
        in_specs=[
            pl.BlockSpec((tbn, feat_pad), lambda b: (b, 0)),
            pl.BlockSpec((pl.Squeezed(), tbn, tbn), lambda b: (b, 0, 0)),
            pl.BlockSpec((tile_b, tbn), lambda b: (0, 0)),          # reused each step
            pl.BlockSpec(tuple(w_slab.shape), lambda b: (0, 0)),    # reused each step
            pl.BlockSpec(tuple(b_slab.shape), lambda b: (0, 0)),    # reused each step
        ],
        out_specs=pl.BlockSpec((tile_b, hidden), lambda b: (b, 0)),
        compiler_params=pltpu.CompilerParams(
            dimension_semantics=("parallel",),   # v7x: one tile per TensorCore
        ),
    )(x_flat, adj_blockdiag, pool_mat, w_slab, b_slab)
    return out_pad[:, 0:1]


# ----------------------------------------------------------------------------
# Deterministic parameter init + consolidated (pre-cast) slabs.
# ----------------------------------------------------------------------------
def init_params(key, ntips, feat_pad, hidden_dim):
    k = jax.random.split(key, 6)
    s1 = 1.0 / math.sqrt(ntips)
    s2 = 1.0 / math.sqrt(hidden_dim)
    w1 = jax.random.uniform(k[0], (ntips, hidden_dim), jnp.float32, -s1, s1)
    b1 = jax.random.uniform(k[1], (1, hidden_dim), jnp.float32, -s1, s1)
    wp1 = jax.random.uniform(k[2], (hidden_dim, hidden_dim), jnp.float32, -s2, s2)
    bp1 = jax.random.uniform(k[3], (1, hidden_dim), jnp.float32, -s2, s2)
    wp2 = jax.random.uniform(k[4], (hidden_dim, 1), jnp.float32, -s2, s2)
    bp2 = jax.random.uniform(k[5], (1, 1), jnp.float32, -s2, s2)
    # Pad w1 rows ntips->feat_pad (zero rows) so bf16 slab slices are 16-aligned;
    # lane-pad the 1-wide head to hidden_dim columns (scalar ends up in col 0).
    w1_pad = jnp.zeros((feat_pad, hidden_dim), jnp.float32).at[:ntips].set(w1)
    wp2_pad = jnp.zeros((hidden_dim, hidden_dim), jnp.float32).at[:, 0:1].set(wp2)
    bp2_pad = jnp.zeros((1, hidden_dim), jnp.float32).at[:, 0:1].set(bp2)
    # Pre-cast the weight slab to bf16 on the host (no per-step in-kernel casts).
    w_slab = jnp.concatenate([w1_pad, wp1, wp2_pad], axis=0).astype(jnp.bfloat16)
    b_slab = jnp.concatenate([b1, bp1, bp2_pad], axis=0)   # (3, H) f32
    return w_slab, b_slab


# ----------------------------------------------------------------------------
# Pure-JAX reference (per-tree semantics, same cast points as the kernel).
# ----------------------------------------------------------------------------
def reference_forward(x_bnh, adj_bnn, w_slab, b_slab, *, ntips, feat_pad):
    B, N, F = x_bnh.shape
    H = b_slab.shape[1]
    w1 = w_slab[0:ntips]                         # bf16, real rows only
    wp1 = w_slab[feat_pad:feat_pad + H]
    wp2 = w_slab[feat_pad + H:feat_pad + 2 * H]
    b1, bp1, bp2 = b_slab[0:1], b_slab[1:2], b_slab[2:3]

    h = jnp.einsum('bnf,fh->bnh', x_bnh.astype(jnp.bfloat16), w1,
                   preferred_element_type=jnp.float32) + b1
    h = h + jnp.einsum('bnm,bmh->bnh', adj_bnn, h,
                       preferred_element_type=jnp.float32)          # f32 aggregation
    h = _elu(h)
    g = jnp.sum(h, axis=1)                                          # f32 sum-pooling
    z = _elu(jnp.dot(g.astype(jnp.bfloat16), wp1,
                     preferred_element_type=jnp.float32) + bp1)
    out = jnp.dot(z.astype(jnp.bfloat16), wp2,
                  preferred_element_type=jnp.float32) + bp2
    return out[:, 0:1]


if __name__ == "__main__":
    ntips = 8                         # 8 leaves -> 14 real nodes per tree
    hidden_dim = 128                  # lane-dense hidden width
    batch = 32                        # trees per call
    tile_b = 16                       # trees per grid step -> TBN = 256, grid = (2,)
    num_nodes = 2 * ntips - 2         # 14 real nodes
    nodes_pad = 16                    # padded nodes per tree (TBN multiple of 128)
    feat_pad = 16                     # padded feature dim (16-row aligned w1 slice)
    tbn = tile_b * nodes_pad          # 256 rows per tile
    num_tiles = batch // tile_b       # 2 grid steps (one per v7x TensorCore)

    # --- host-side: build B distinct tree topologies, embed, build adjacency.
    feats_list, adj_list = [], []
    for b in range(batch):
        leaf_names = np.roll(np.arange(ntips), b % ntips)   # deterministic relabeling
        tree = build_caterpillar_tree(ntips, leaf_names)
        f, ei = node_embedding(tree, ntips)                  # (14, 8), (14, 3)
        feats_list.append(f)
        adj_list.append(edge_index_to_adjacency_np(ei, num_nodes))
    feats = np.stack(feats_list, axis=0)                     # (B, 14, 8)
    adjs = np.stack(adj_list, axis=0)                        # (B, 14, 14)

    # Padded flat node features (trees stacked row-wise, zero pad rows/cols).
    x_flat_np = np.zeros((batch * nodes_pad, feat_pad), dtype=np.float32)
    for b in range(batch):
        x_flat_np[b * nodes_pad:b * nodes_pad + num_nodes, :ntips] = feats[b]

    # Block-diagonal adjacency per tile of TB trees (padded rows/cols stay zero).
    adj_bd_np = np.zeros((num_tiles, tbn, tbn), dtype=np.float32)
    for t in range(num_tiles):
        for i in range(tile_b):
            lo = i * nodes_pad
            adj_bd_np[t, lo:lo + num_nodes, lo:lo + num_nodes] = adjs[t * tile_b + i]

    # 0/1 sum-pooling matrix over each tree's 14 *real* node rows only
    # (padded rows evaluate to elu(b1) after the conv and must be excluded).
    pool_np = np.zeros((tile_b, tbn), dtype=np.float32)
    for i in range(tile_b):
        pool_np[i, i * nodes_pad:i * nodes_pad + num_nodes] = 1.0

    # Device operands: x in bf16 (feature-lift matmul); adjacency / pooling in
    # f32 (f32 aggregation); weight slab pre-cast bf16; biases f32.
    x_flat = jnp.asarray(x_flat_np).astype(jnp.bfloat16)
    adj_bd = jnp.asarray(adj_bd_np)
    pool_mat = jnp.asarray(pool_np)
    w_slab, b_slab = init_params(jax.random.PRNGKey(0), ntips, feat_pad, hidden_dim)

    out = gnn_model_forward_batched(x_flat, adj_bd, pool_mat, w_slab, b_slab,
                                    nodes_pad=nodes_pad, tile_b=tile_b)
    out = jax.block_until_ready(out)

    assert out.shape == (batch, 1) and out.dtype == jnp.float32
    assert bool(jnp.isfinite(out).all())

    # Cross-check against a per-tree pure-JAX reference with matching precision.
    ref = jax.block_until_ready(
        reference_forward(jnp.asarray(feats), jnp.asarray(adjs), w_slab, b_slab,
                          ntips=ntips, feat_pad=feat_pad))
    np.testing.assert_allclose(np.asarray(out), np.asarray(ref), rtol=2e-2, atol=2e-2)

    print("KERNEL_OK")
</pallas_src>

<mosaic_0001>
module attributes {stable_mosaic.version = 11 : i64} {
  func.func @gnn_batched_kernel(%arg0: i32, %arg1: memref<256x16xbf16, #tpu.memory_space<vmem>>, %arg2: memref<1x256x256xf32, #tpu.memory_space<vmem>>, %arg3: memref<16x256xf32, #tpu.memory_space<vmem>>, %arg4: memref<272x128xbf16, #tpu.memory_space<vmem>>, %arg5: memref<3x128xf32, #tpu.memory_space<vmem>>, %arg6: memref<16x128xf32, #tpu.memory_space<vmem>>) attributes {dimension_semantics = [#tpu.dimension_semantics<parallel>], iteration_bounds = array<i64: 2>, scalar_prefetch = 0 : i64, scratch_operands = 0 : i64, tpu.core_type = #tpu.core_type<tc>, window_params = [{transform_indices = @transform_0, window_bounds = array<i64: 256, 16>}, {transform_indices = @transform_1, window_bounds = array<i64: 1, 256, 256>}, {pipeline_mode = #tpu.pipeline_mode<synchronous>, transform_indices = @transform_2, window_bounds = array<i64: 16, 256>}, {pipeline_mode = #tpu.pipeline_mode<synchronous>, transform_indices = @transform_3, window_bounds = array<i64: 272, 128>}, {pipeline_mode = #tpu.pipeline_mode<synchronous>, transform_indices = @transform_4, window_bounds = array<i64: 3, 128>}, {transform_indices = @transform_5, window_bounds = array<i64: 16, 128>}]} {
    %c0 = arith.constant 0 : index
    %c0_0 = arith.constant 0 : index
    %0 = vector.load %arg4[%c0, %c0_0] : memref<272x128xbf16, #tpu.memory_space<vmem>>, vector<16x128xbf16>
    %c16 = arith.constant 16 : index
    %c0_1 = arith.constant 0 : index
    %1 = vector.load %arg4[%c16, %c0_1] : memref<272x128xbf16, #tpu.memory_space<vmem>>, vector<128x128xbf16>
    %c144 = arith.constant 144 : index
    %c0_2 = arith.constant 0 : index
    %2 = vector.load %arg4[%c144, %c0_2] : memref<272x128xbf16, #tpu.memory_space<vmem>>, vector<128x128xbf16>
    %c0_3 = arith.constant 0 : index
    %c0_4 = arith.constant 0 : index
    %3 = vector.load %arg5[%c0_3, %c0_4] : memref<3x128xf32, #tpu.memory_space<vmem>>, vector<1x128xf32>
    %c1 = arith.constant 1 : index
    %c0_5 = arith.constant 0 : index
    %4 = vector.load %arg5[%c1, %c0_5] : memref<3x128xf32, #tpu.memory_space<vmem>>, vector<1x128xf32>
    %c2 = arith.constant 2 : index
    %c0_6 = arith.constant 0 : index
    %5 = vector.load %arg5[%c2, %c0_6] : memref<3x128xf32, #tpu.memory_space<vmem>>, vector<1x128xf32>
    %c0_7 = arith.constant 0 : index
    %c0_8 = arith.constant 0 : index
    %6 = vector.load %arg1[%c0_7, %c0_8] : memref<256x16xbf16, #tpu.memory_space<vmem>>, vector<256x16xbf16>
    %cst = arith.constant dense<0.000000e+00> : vector<256x128xf32>
    %7 = tpu.matmul %6, %0, %cst {dimension_numbers = #tpu.dot_dimension_numbers<[1], [0], [0], [1], [0, 0, 1, 1], [], []>} : vector<256x16xbf16>, vector<16x128xbf16>, vector<256x128xf32> -> vector<256x128xf32>
    %8 = vector.broadcast %3 : vector<1x128xf32> to vector<256x128xf32>
    %9 = arith.addf %7, %8 : vector<256x128xf32>
    %c0_9 = arith.constant 0 : index
    %c0_10 = arith.constant 0 : index
    %c0_11 = arith.constant 0 : index
    %10 = vector.load %arg2[%c0_9, %c0_10, %c0_11] : memref<1x256x256xf32, #tpu.memory_space<vmem>>, vector<1x256x256xf32>
    %11 = vector.shape_cast %10 : vector<1x256x256xf32> to vector<256x256xf32>
    %cst_12 = arith.constant dense<0.000000e+00> : vector<256x128xf32>
    %12 = tpu.matmul %11, %9, %cst_12 {dimension_numbers = #tpu.dot_dimension_numbers<[1], [0], [0], [1], [0, 0, 1, 1], [], []>} : vector<256x256xf32>, vector<256x128xf32>, vector<256x128xf32> -> vector<256x128xf32>
    %13 = arith.addf %9, %12 : vector<256x128xf32>
    %cst_13 = arith.constant 0.000000e+00 : f32
    %14 = vector.broadcast %cst_13 : f32 to vector<256x128xf32>
    %15 = arith.cmpf ogt, %13, %14 : vector<256x128xf32>
    %cst_14 = arith.constant 0.000000e+00 : f32
    %16 = vector.broadcast %cst_14 : f32 to vector<256x128xf32>
    %17 = arith.minimumf %13, %16 : vector<256x128xf32>
    %18 = math.exp %17 : vector<256x128xf32>
    %cst_15 = arith.constant 1.000000e+00 : f32
    %19 = vector.broadcast %cst_15 : f32 to vector<256x128xf32>
    %20 = arith.subf %18, %19 : vector<256x128xf32>
    %21 = arith.select %15, %13, %20 : vector<256x128xi1>, vector<256x128xf32>
    %c0_16 = arith.constant 0 : index
    %c0_17 = arith.constant 0 : index
    %22 = vector.load %arg3[%c0_16, %c0_17] : memref<16x256xf32, #tpu.memory_space<vmem>>, vector<16x256xf32>
    %cst_18 = arith.constant dense<0.000000e+00> : vector<16x128xf32>
    %23 = tpu.matmul %22, %21, %cst_18 {dimension_numbers = #tpu.dot_dimension_numbers<[1], [0], [0], [1], [0, 0, 1, 1], [], []>} : vector<16x256xf32>, vector<256x128xf32>, vector<16x128xf32> -> vector<16x128xf32>
    %24 = arith.truncf %23 : vector<16x128xf32> to vector<16x128xbf16>
    %cst_19 = arith.constant dense<0.000000e+00> : vector<16x128xf32>
    %25 = tpu.matmul %24, %1, %cst_19 {dimension_numbers = #tpu.dot_dimension_numbers<[1], [0], [0], [1], [0, 0, 1, 1], [], []>} : vector<16x128xbf16>, vector<128x128xbf16>, vector<16x128xf32> -> vector<16x128xf32>
    %26 = vector.broadcast %4 : vector<1x128xf32> to vector<16x128xf32>
    %27 = arith.addf %25, %26 : vector<16x128xf32>
    %cst_20 = arith.constant 0.000000e+00 : f32
    %28 = vector.broadcast %cst_20 : f32 to vector<16x128xf32>
    %29 = arith.cmpf ogt, %27, %28 : vector<16x128xf32>
    %cst_21 = arith.constant 0.000000e+00 : f32
    %30 = vector.broadcast %cst_21 : f32 to vector<16x128xf32>
    %31 = arith.minimumf %27, %30 : vector<16x128xf32>
    %32 = math.exp %31 : vector<16x128xf32>
    %cst_22 = arith.constant 1.000000e+00 : f32
    %33 = vector.broadcast %cst_22 : f32 to vector<16x128xf32>
    %34 = arith.subf %32, %33 : vector<16x128xf32>
    %35 = arith.select %29, %27, %34 : vector<16x128xi1>, vector<16x128xf32>
    %36 = arith.truncf %35 : vector<16x128xf32> to vector<16x128xbf16>
    %cst_23 = arith.constant dense<0.000000e+00> : vector<16x128xf32>
    %37 = tpu.matmul %36, %2, %cst_23 {dimension_numbers = #tpu.dot_dimension_numbers<[1], [0], [0], [1], [0, 0, 1, 1], [], []>} : vector<16x128xbf16>, vector<128x128xbf16>, vector<16x128xf32> -> vector<16x128xf32>
    %38 = vector.broadcast %5 : vector<1x128xf32> to vector<16x128xf32>
    %39 = arith.addf %37, %38 : vector<16x128xf32>
    %c0_24 = arith.constant 0 : index
    %c0_25 = arith.constant 0 : index
    %40 = vector.load %arg6[%c0_24, %c0_25] : memref<16x128xf32, #tpu.memory_space<vmem>>, vector<16x128xf32>
    tpu.vector_store %arg6[%c0_24, %c0_25], %39 {strides = array<i32>} : memref<16x128xf32, #tpu.memory_space<vmem>>, vector<16x128xf32>,
    return
  }
  func.func @transform_0(%arg0: i32) -> (i32, i32) {
    %c0_i32 = arith.constant 0 : i32
    %c0_i32_0 = arith.constant 0 : i32
    return %arg0, %c0_i32 : i32, i32
  }
  func.func @transform_1(%arg0: i32) -> (i32, i32, i32) {
    %c0_i32 = arith.constant 0 : i32
    %c0_i32_0 = arith.constant 0 : i32
    %c0_i32_1 = arith.constant 0 : i32
    return %arg0, %c0_i32, %c0_i32_0 : i32, i32, i32
  }
  func.func @transform_2(%arg0: i32) -> (i32, i32) {
    %c0_i32 = arith.constant 0 : i32
    %c0_i32_0 = arith.constant 0 : i32
    %c0_i32_1 = arith.constant 0 : i32
    return %c0_i32, %c0_i32_0 : i32, i32
  }
  func.func @transform_3(%arg0: i32) -> (i32, i32) {
    %c0_i32 = arith.constant 0 : i32
    %c0_i32_0 = arith.constant 0 : i32
    %c0_i32_1 = arith.constant 0 : i32
    return %c0_i32, %c0_i32_0 : i32, i32
  }
  func.func @transform_4(%arg0: i32) -> (i32, i32) {
    %c0_i32 = arith.constant 0 : i32
    %c0_i32_0 = arith.constant 0 : i32
    %c0_i32_1 = arith.constant 0 : i32
    return %c0_i32, %c0_i32_0 : i32, i32
  }
  func.func @transform_5(%arg0: i32) -> (i32, i32) {
    %c0_i32 = arith.constant 0 : i32
    %c0_i32_0 = arith.constant 0 : i32
    return %arg0, %c0_i32 : i32, i32
  }
}

</mosaic_0001>

<bundles_post_ra>
// kernel: tpu_custom_call.1
= control target key start
LH: loop header
LB: loop body
LE: loop exit
PB: predicated region body
PF: predicated region fallthrough
CT: control target
= control target key end

     0   :  { %10 = vsyncpa [#allocation3], 0  ;;  %s2627_s0 = inlined_call_operand.vmem [shape: bf16[512,16], index: 0, kind: input, shape index: {}]   ;;  %s2628_s1 = inlined_call_operand.hbm [shape: f32[2,256,256], index: 1, kind: input, shape index: {}]   ;;  %s2629_s2 = inlined_call_operand.vmem [shape: f32[16,256], index: 2, kind: input, shape index: {}]   ;;  %s2630_s3 = inlined_call_operand.vmem [shape: bf16[272,128], index: 3, kind: input, shape index: {}]   ;;  %s2631_s4 = inlined_call_operand.vmem [shape: f32[3,128], index: 4, kind: input, shape index: {}]   ;;  %s2632_s5 = inlined_call_operand.hbm [shape: f32[32,128], index: 5, kind: output, shape index: {}]  }
   0x1   :  { %12 = vsyncpa [#allocation3 + $0x1], 0 }
   0x2   :  { %13 = vsyncpa [#allocation4], 0 }
   0x3   :  { %15 = vsyncpa [#allocation4 + $0x1], 0  ;;  %s1888_s18 = smov 0   ;;  %s1890_s19 = smov 0  }
   0x4   :  { %s1892_s20 = smov 0   ;;  %s1894_s21 = smov 0  }
   0x5 LB: > { %s1909_s22 = sadd.s32 4294967295, %s1852_s21   ;;  %s1370_s23 = sadd.s32 4294967294, %s1852_s21   ;;  %s1852_s21 = sphi %s1894_s21, %s2669_s21   ;;  %s1848_s20 = sphi %s1892_s20, %s2668_s20   ;;  %s1844_s19 = sphi %s1890_s19, %s2667_s19   ;;  %s1840_s18 = sphi %s1888_s18, %s2666_s18  }
   0x6   : > { %s1913_s24 = sadd.s32 1, %s1852_s21   ;;  %s54_s25 = sadd.s32 1, %s1848_s20 }
   0x7   : > { %s51_s26 = ssub.s32 %s1852_s21, %s1913_s24  ;;  %p61_p0 = scmp.ne.s32.totalorder %s1848_s20, %s1844_s19 }
   0x8   : > { %p52_p1 = scmp.eq.s32.totalorder %s51_s26, 0  ;;  %p62_p2 = scmp.eq.s32.totalorder %s1852_s21, 0 }
   0x9   : > { %p67_p3 = scmp.ne.s32.totalorder %s1844_s19, %s1840_s18  ;;  %p68_p4 = scmp.eq.s32.totalorder %s1909_s22, 0 }
   0xa   : > { %s1925_s27 = scalar_select %p52_p1, %s1848_s20, %s54_s25  }
   0xb   : > { %p1927_p5 = por %p62_p2, %p61_p0  ;;  %p1931_p6 = por %p68_p4, %p67_p3 }
   0xc   : > { %p154_p7 = scmp.eq.s32.totalorder %s1909_s22, 1  ;;  %p160_p8 = scmp.eq.s32.totalorder %s1370_s23, 1 }
   0xd   : > { %p1647_p10 = scmp.lt.s32.totalorder %s1852_s21, 2  ;;  %s198_s7 = sand.u32 1, %s1848_s20  }
   0xe   : > { %p1938_p11 = por %p154_p7, %p61_p0  ;;  %p1942_p12 = por %p160_p8, %p67_p3 }
   0xf   : > { %s1568_s8 = sshll.u32 %s1852_s21, 9  ;;  %s1373_s9 = sshll.u32 %s198_s7, 9 }
  0x10   : > { %s207_s12 = scalar_lea.hbm %s2628_s1, %s1568_s8  ;;  %s202_s14 = scalar_lea.vmem [#allocation2], %s1373_s9 }
  0x11   : > { %s208_s13 = sshll.u32 %s207_s12, 4  ;;  %s210_s15 = sshll.u32 %s202_s14, 4  ;;  %s209_s13 = int_to_ptr.hbm [resolvable:$true] %s208_s13  ;;  %s211_s15 = int_to_ptr.vmem [resolvable:$true] %s210_s15 }
  0x12   : > { %p1953_p13 = pnand %p1647_p10, %p1927_p5  ;;  %p1376_p0 = scmp.ge.s32.totalorder %s1852_s21, 1 }
  0x13   : > { %p218_p1 = scmp.lt.s32.totalorder %s1852_s21, 3  ;;  %s199_s17 = scalar_lea.sflag [#allocation3], %s198_s7 }
  0x14   : > { %s1756_s23 = sshra.s32 %s209_s13, 4  ;;  %p1760_p3 = pneg %p1953_p13  ;;  %s1757_s23 = int_to_ptr.hbm [resolvable:$true] %s1756_s23 }
  0x15   : > { %s1758_s25 = scalar_lea.hbm %s1757_s23, 512  ;;  %s1763_s28 = scalar_lea.hbm %s2628_s1, 1024 }
  0x16   : > { %p1759_p2 = scmp.ne.s32.totalorder %s1757_s23, %s1758_s25  ;;  %p1764_p5 = scmp.lt.s32.totalorder %s1757_s23, %s2628_s1 }
  0x17   : > { %p1765_p8 = scmp.lt.s32.totalorder %s1763_s28, %s1758_s25 }
  0x18   : > { %p1761_p4 = pnand %p1760_p3, %p1759_p2 }
  0x19   : > { %p1766_p10 = por %p1765_p8, %p1764_p5 }
  0x1a   : > { %p1762_p7 = pneg %p1761_p4 }
  0x1c   : > { %p1767_p9 = pnand %p1766_p10, %p1762_p7 }
  0x1e   : > { %1770 = shalt.err (!%p1767_p9)
}
  0x1f   : > { %s1854_s7 = smov 256   ;;  %s1855_s11 = smov 16  }
  0x20   : > { %1642 = dma.hbm_to_vmem [thread:$0]  (!%p1953_p13), %s209_s13, 8192, %s211_s15, %s199_s17, %s1854_s7, %s1854_s7, %s1855_s11  }
  0x21   : > { %p219_p2 = pnand %p1376_p0, %p218_p1 }
  0x23   : > { %222 = sbr.rel (%p219_p2) target bundleno = 1285 (0x505), region = 40 }
  0x28   : > { %s1974_s12 = sand.u32 1, %s1844_s19  }
  0x29   : > { %s1377_s14 = sshll.u32 %s1974_s12, 9  ;;  %s225_s23 = scalar_lea.sflag [#allocation3], %s1974_s12 }
  0x2a   : > { %s1978_s25 = scalar_lea.vmem [#allocation2], %s1377_s14 }
  0x2b   : > { %1831 = dma.done.wait (%p1931_p6), %s225_s23, 8192  }
  0x2c   : > { %1833 = vsyncadd (%p1931_p6), %s225_s23, 4294959104  ;;  %s1379_s13 = sshll.u32 %s1909_s22, 5  ;;  %v1569_v0 = vld [vmem:[%s2630_s3] sm:$0xff]  ;;  %vm425_vm0 = vcmask 130048   ;;  %v617_v61 = vld [vmem:[%s1978_s25 + $0x1b0] sm:$0xff]  ;;  %s1378_s28 = sshll.u32 %s1974_s12, 4 }
  0x2d   : > { %p262_p9 = scmp.lt.s32.totalorder %s1379_s13, 63  ;;  %481 = vmatpush.bf16.msra.mxu0 %v1569_v0  ;;  %v2036_v32 = vld [vmem:[%s2631_s4] ss:$0 sm:$0xff]  ;;  %s1602_s10 = sshll.u32 %s1909_s22, 4 }
  0x2e   : > { %v619_v63 = vld [vmem:[%s1978_s25 + $0x1c0] sm:$0xff]  ;;  %s1281_s14 = scalar_lea.hbm %s2632_s5, %s1602_s10  ;;  %s260_s23 = scalar_lea.vmem [#allocation5], %s1378_s28 }
  0x2f   : > { %s2671_s13 = smov (!%p262_p9, %s1379_s13), 63  ;;  %s1806_s8 = scalar_lea.hbm %s2632_s5, 32 }
  0x30   : > { %s1380_s15 = sshll.u32 %s2671_s13, 2  ;;  %s1284_s13 = sshll.u32 %s1281_s14, 4  ;;  %s1285_s13 = int_to_ptr.hbm [resolvable:$true] %s1284_s13 }
  0x31   : > { %s1988_s26 = scalar_lea.vmem %s2627_s0, %s1380_s15  ;;  %s1270_s15 = scalar_lea.sflag [#allocation4], %s1974_s12 }
  0x32   : > { %v1586_v1 = vld [vmem:[%s1988_s26] sm:$0xff]  ;;  %v1587_v2 = vld [vmem:[%s1988_s26 + $0x8] sm:$0xff]  ;;  %v1588_v3 = vld [vmem:[%s1988_s26 + $0x10] sm:$0xff]  ;;  %s1800_s16 = sshra.s32 %s1285_s13, 4  ;;  %s1801_s16 = int_to_ptr.hbm [resolvable:$true] %s1800_s16 }
  0x33   : > { %1449 = vmatmul.msk.bf16.vlgmr.msra.gmra.mxu0 %vm425_vm0, %v1586_v1  ;;  %v1589_v4 = vld [vmem:[%s1988_s26 + $0x18] sm:$0xff]  ;;  %v1590_v5 = vld [vmem:[%s1988_s26 + $0x20] sm:$0xff]  ;;  %v1591_v6 = vld [vmem:[%s1988_s26 + $0x28] sm:$0xff]  ;;  %s1802_s22 = scalar_lea.hbm %s1801_s16, 16  ;;  %p1807_p1 = scmp.lt.s32.totalorder %s1801_s16, %s2632_s5 }
  0x34   : > { %v1592_v7 = vld [vmem:[%s1988_s26 + $0x30] sm:$0xff]  ;;  %v1593_v8 = vld [vmem:[%s1988_s26 + $0x38] sm:$0xff]  ;;  %v1594_v9 = vld [vmem:[%s1988_s26 + $0x40] sm:$0xff]  ;;  %p1803_p6 = scmp.ne.s32.totalorder %s1801_s16, %s1802_s22  ;;  %p1808_p3 = scmp.lt.s32.totalorder %s1806_s8, %s1802_s22 }
  0x35   : > { %v1595_v12 = vld [vmem:[%s1988_s26 + $0x48] sm:$0xff]  ;;  %v1596_v15 = vld [vmem:[%s1988_s26 + $0x50] sm:$0xff]  ;;  %v1597_v18 = vld [vmem:[%s1988_s26 + $0x58] sm:$0xff] }
  0x36   : > { %v1598_v21 = vld [vmem:[%s1988_s26 + $0x60] sm:$0xff]  ;;  %v1599_v24 = vld [vmem:[%s1988_s26 + $0x68] sm:$0xff]  ;;  %v1600_v27 = vld [vmem:[%s1988_s26 + $0x70] sm:$0xff]  ;;  %p1804_p13 = pnand %p1803_p6, %p1938_p11  ;;  %p1809_p4 = por %p1808_p3, %p1807_p1 }
  0x37   : > { %v1601_v30 = vld [vmem:[%s1988_s26 + $0x78] sm:$0xff]  ;;  %v621_v1 = vld [vmem:[%s1978_s25 + $0x1d0] sm:$0xff] }
  0x38   : > { %p1805_p0 = pneg %p1804_p13 }
  0x3a   : > { %p1810_p7 = pnand %p1809_p4, %p1805_p0 }
  0x43   : > { %1450 = vmatmul.msk.bf16.gmra.mxu0 %vm425_vm0, %v1587_v2 }
  0x53   : > { %1451 = vmatmul.msk.bf16.gmra.mxu0 %vm425_vm0, %v1588_v3  ;;  %v623_v3 = vld [vmem:[%s1978_s25 + $0x1e0] sm:$0xff] }
  0x63   : > { %1452 = vmatmul.msk.bf16.gmra.mxu0 %vm425_vm0, %v1589_v4 }
  0x73   : > { %1453 = vmatmul.msk.bf16.gmra.mxu0 %vm425_vm0, %v1590_v5  ;;  %v625_v5 = vld [vmem:[%s1978_s25 + $0x1f0] sm:$0xff] }
  0x83   : > { %1454 = vmatmul.msk.bf16.gmra.mxu0 %vm425_vm0, %v1591_v6 }
  0x93   : > { %1455 = vmatmul.msk.bf16.gmra.mxu0 %vm425_vm0, %v1592_v7 }
  0xa3   : > { %1456 = vmatmul.msk.bf16.gmra.mxu0 %vm425_vm0, %v1593_v8  ;;  %v563_v8 = vld [vmem:[%s1978_s25] sm:$0xff] }
  0xb0   : > { %v2010_v10 = vpop.f32.mrf.mxu0 }
  0xb1   : > { %v2122_v52 = vadd.f32 %v2036_v32, %v2010_v10 }
  0xb3   : > { %1457 = vmatmul.msk.bf16.gmra.mxu0 %vm425_vm0, %v1594_v9 }
  0xb8   : > { %v2013_v11 = vpop.f32.mrf.mxu0 }
  0xb9   : > { %v2116_v51 = vadd.f32 %v2036_v32, %v2013_v11 }
  0xc0   : > { %v2016_v13 = vpop.f32.mrf.mxu0 }
  0xc1   : > { %v2110_v50 = vadd.f32 %v2036_v32, %v2016_v13  ;;  %v565_v13 = vld [vmem:[%s1978_s25 + $0x10] sm:$0xff] }
  0xc3   : > { %1458 = vmatmul.msk.bf16.gmra.mxu0 %vm425_vm0, %v1595_v12 }
  0xc8   : > { %v2019_v14 = vpop.f32.mrf.mxu0 }
  0xc9   : > { %v2104_v49 = vadd.f32 %v2036_v32, %v2019_v14 }
  0xd0   : > { %v493_v16 = vpop.f32.mrf.mxu0 }
  0xd1   : > { %v2096_v47 = vadd.f32 %v2036_v32, %v493_v16 }
  0xd3   : > { %1459 = vmatmul.msk.bf16.gmra.mxu0 %vm425_vm0, %v1596_v15 }
  0xd8   : > { %v495_v17 = vpop.f32.mrf.mxu0 }
  0xd9   : > { %v2091_v46 = vadd.f32 %v2036_v32, %v495_v17 }
  0xe0   : > { %v498_v19 = vpop.f32.mrf.mxu0 }
  0xe1   : > { %v2086_v45 = vadd.f32 %v2036_v32, %v498_v19 }
  0xe3   : > { %1460 = vmatmul.msk.bf16.gmra.mxu0 %vm425_vm0, %v1597_v18  ;;  %v567_v18 = vld [vmem:[%s1978_s25 + $0x20] sm:$0xff] }
  0xe8   : > { %v500_v20 = vpop.f32.mrf.mxu0 }
  0xe9   : > { %v2081_v44 = vadd.f32 %v2036_v32, %v500_v20 }
  0xf0   : > { %v503_v22 = vpop.f32.mrf.mxu0 }
  0xf1   : > { %v2074_v42 = vadd.f32 %v2036_v32, %v503_v22 }
  0xf3   : > { %1461 = vmatmul.msk.bf16.gmra.mxu0 %vm425_vm0, %v1598_v21 }
  0xf8   : > { %v505_v23 = vpop.f32.mrf.mxu0 }
  0xf9   : > { %v2069_v41 = vadd.f32 %v2036_v32, %v505_v23  ;;  %v569_v23 = vld [vmem:[%s1978_s25 + $0x30] sm:$0xff] }
 0x100   : > { %v508_v25 = vpop.f32.mrf.mxu0 }
 0x101   : > { %v2064_v40 = vadd.f32 %v2036_v32, %v508_v25 }
 0x103   : > { %1462 = vmatmul.msk.bf16.gmra.mxu0 %vm425_vm0, %v1599_v24 }
 0x108   : > { %v510_v26 = vpop.f32.mrf.mxu0 }
 0x109   : > { %v2059_v39 = vadd.f32 %v2036_v32, %v510_v26 }
 0x110   : > { %v513_v28 = vpop.f32.mrf.mxu0 }
 0x111   : > { %v2052_v37 = vadd.f32 %v2036_v32, %v513_v28  ;;  %v618_v28 = vld [vmem:[%s1978_s25 + $0x1b8] sm:$0xff] }
 0x113   : > { %1463 = vmatmul.msk.bf16.gmra.mxu0 %vm425_vm0, %v1600_v27  ;;  %v564_v27 = vld [vmem:[%s1978_s25 + $0x8] sm:$0xff] }
 0x118   : > { %v515_v29 = vpop.f32.mrf.mxu0 }
 0x119   : > { %v2047_v36 = vadd.f32 %v2036_v32, %v515_v29  ;;  %v571_v29 = vld [vmem:[%s1978_s25 + $0x40] sm:$0xff] }
 0x120   : > { %v518_v31 = vpop.f32.mrf.mxu0 }
 0x121   : > { %v2042_v35 = vadd.f32 %v2036_v32, %v518_v31  ;;  %v620_v31 = vld [vmem:[%s1978_s25 + $0x1c8] sm:$0xff] }
 0x123   : > { %1464 = vmatmul.msk.bf16.gmra.mxu0 %vm425_vm0, %v1601_v30  ;;  %v566_v30 = vld [vmem:[%s1978_s25 + $0x18] sm:$0xff] }
 0x128   : > { %v520_v33 = vpop.f32.mrf.mxu0 }
 0x129   : > { %v2039_v34 = vadd.f32 %v2036_v32, %v520_v33  ;;  %v568_v33 = vld [vmem:[%s1978_s25 + $0x28] sm:$0xff] }
 0x12b   : > { %627 = vmatpush.msra.mxu1 %v2039_v34  ;;  %1603 = vmatpush.msra.mxu3 %v2039_v34 }
 0x12d   : > { %628 = vmatpush.msra.mxu1 %v2042_v35  ;;  %1604 = vmatpush.msra.mxu3 %v2042_v35 }
 0x12f   : > { %629 = vmatpush.msra.mxu1 %v2047_v36  ;;  %1605 = vmatpush.msra.mxu3 %v2047_v36 }
 0x130   : > { %v2056_v38 = vpop.f32.mrf.mxu0 }
 0x131   : > { %630 = vmatpush.msra.mxu1 %v2052_v37  ;;  %1606 = vmatpush.msra.mxu3 %v2052_v37  ;;  %v2217_v26 = vadd.f32 %v2036_v32, %v2056_v38  ;;  %v622_v38 = vld [vmem:[%s1978_s25 + $0x1d8] sm:$0xff] }
 0x133   : > { %631 = vmatpush.msra.mxu1 %v2059_v39  ;;  %1607 = vmatpush.msra.mxu3 %v2059_v39  ;;  %2655 = vst [vmem:[#allocation16_spill] sm:$0xff] %v2217_v26 }
 0x135   : > { %632 = vmatpush.msra.mxu1 %v2064_v40  ;;  %1608 = vmatpush.msra.mxu3 %v2064_v40 }
 0x137   : > { %633 = vmatpush.msra.mxu1 %v2069_v41  ;;  %1609 = vmatpush.msra.mxu3 %v2069_v41 }
 0x138   : > { %v2078_v43 = vpop.f32.mrf.mxu0 }
 0x139   : > { %634 = vmatpush.msra.mxu1 %v2074_v42  ;;  %1610 = vmatpush.msra.mxu3 %v2074_v42  ;;  %v2211_v25 = vadd.f32 %v2036_v32, %v2078_v43  ;;  %v575_v43 = vld [vmem:[%s1978_s25 + $0x60] sm:$0xff] }
 0x13b   : > { %635 = vmatpush.msra.mxu1 %v2081_v44  ;;  %1611 = vmatpush.msra.mxu3 %v2081_v44  ;;  %2654 = vst [vmem:[#allocation15_spill] sm:$0xff] %v2211_v25 }
 0x13d   : > { %636 = vmatpush.msra.mxu1 %v2086_v45  ;;  %1612 = vmatpush.msra.mxu3 %v2086_v45 }
 0x13f   : > { %637 = vmatpush.msra.mxu1 %v2091_v46  ;;  %1613 = vmatpush.msra.mxu3 %v2091_v46 }
 0x140   : > { %v2100_v48 = vpop.f32.mrf.mxu0 }
 0x141   : > { %638 = vmatpush.msra.mxu1 %v2096_v47  ;;  %1614 = vmatpush.msra.mxu3 %v2096_v47  ;;  %v2205_v24 = vadd.f32 %v2036_v32, %v2100_v48  ;;  %v570_v48 = vld [vmem:[%s1978_s25 + $0x38] sm:$0xff] }
 0x143   : > { %639 = vmatpush.msra.mxu1 %v2104_v49  ;;  %1615 = vmatpush.msra.mxu3 %v2104_v49  ;;  %2653 = vst [vmem:[#allocation14_spill] sm:$0xff] %v2205_v24 }
 0x145   : > { %640 = vmatpush.msra.mxu1 %v2110_v50  ;;  %1616 = vmatpush.msra.mxu3 %v2110_v50 }
 0x147   : > { %641 = vmatpush.msra.mxu1 %v2116_v51  ;;  %1617 = vmatpush.msra.mxu3 %v2116_v51 }
 0x148   : > { %v2126_v53 = vpop.f32.mrf.mxu0 }
 0x149   : > { %642 = vmatpush.msra.mxu1 %v2122_v52  ;;  %1618 = vmatpush.msra.mxu3 %v2122_v52  ;;  %v2198_v22 = vadd.f32 %v2036_v32, %v2126_v53  ;;  %v624_v53 = vld [vmem:[%s1978_s25 + $0x1e8] sm:$0xff] }
 0x14a   : > { %724 = vmatmul.f32.vlgmr.msra.gmra.mxu3 %v617_v61  ;;  %643 = vmatmul.f32.vlgmr.msra.gmra.mxu1 %v563_v8  ;;  %v583_v61 = vld [vmem:[%s1978_s25 + $0xa0] sm:$0xff]  ;;  %v593_v8 = vld [vmem:[%s1978_s25 + $0xf0] sm:$0xff] }
 0x14b   : > { %2652 = vst [vmem:[#allocation13_spill] sm:$0xff] %v2198_v22 }
 0x150   : > { %v533_v54 = vpop.f32.mrf.mxu0 }
 0x151   : > { %v2192_v21 = vadd.f32 %v2036_v32, %v533_v54  ;;  %v577_v54 = vld [vmem:[%s1978_s25 + $0x70] sm:$0xff] }
 0x152   : > { %727 = vmatmul.f32.gmra.mxu3 %v619_v63  ;;  %646 = vmatmul.f32.gmra.mxu1 %v565_v13  ;;  %v585_v63 = vld [vmem:[%s1978_s25 + $0xb0] sm:$0xff]  ;;  %v588_v13 = vld [vmem:[%s1978_s25 + $0xc8] sm:$0xff] }
 0x153   : > { %2651 = vst [vmem:[#allocation12_spill] sm:$0xff] %v2192_v21 }
 0x158   : > { %v535_v55 = vpop.f32.mrf.mxu0 }
 0x159   : > { %v2187_v20 = vadd.f32 %v2036_v32, %v535_v55  ;;  %v572_v55 = vld [vmem:[%s1978_s25 + $0x48] sm:$0xff] }
 0x15a   : > { %730 = vmatmul.f32.gmra.mxu3 %v621_v1  ;;  %649 = vmatmul.f32.gmra.mxu1 %v567_v18  ;;  %v587_v1 = vld [vmem:[%s1978_s25 + $0xc0] sm:$0xff] }
 0x15b   : > { %2650 = vst [vmem:[#allocation11_spill] sm:$0xff] %v2187_v20 }
 0x160   : > { %v538_v56 = vpop.f32.mrf.mxu0 }
 0x161   : > { %v2182_v19 = vadd.f32 %v2036_v32, %v538_v56  ;;  %v626_v56 = vld [vmem:[%s1978_s25 + $0x1f8] sm:$0xff] }
 0x162   : > { %733 = vmatmul.f32.gmra.mxu3 %v623_v3  ;;  %652 = vmatmul.f32.gmra.mxu1 %v569_v23  ;;  %v589_v3 = vld [vmem:[%s1978_s25 + $0xd0] sm:$0xff]  ;;  %v590_v23 = vld [vmem:[%s1978_s25 + $0xd8] sm:$0xff] }
 0x163   : > { %2649 = vst [vmem:[#allocation10_spill] sm:$0xff] %v2182_v19 }
 0x168   : > { %v540_v57 = vpop.f32.mrf.mxu0 }
 0x169   : > { %v2176_v17 = vadd.f32 %v2036_v32, %v540_v57  ;;  %v579_v57 = vld [vmem:[%s1978_s25 + $0x80] sm:$0xff] }
 0x16a   : > { %736 = vmatmul.f32.gmra.mxu3 %v625_v5  ;;  %655 = vmatmul.f32.gmra.mxu1 %v571_v29  ;;  %v591_v5 = vld [vmem:[%s1978_s25 + $0xe0] sm:$0xff]  ;;  %v592_v29 = vld [vmem:[%s1978_s25 + $0xe8] sm:$0xff] }
 0x16b   : > { %2648 = vst [vmem:[#allocation9_spill] sm:$0xff] %v2176_v17 }
 0x170   : > { %v543_v58 = vpop.f32.mrf.mxu0 }
 0x171   : > { %v2171_v16 = vadd.f32 %v2036_v32, %v543_v58  ;;  %v574_v58 = vld [vmem:[%s1978_s25 + $0x58] sm:$0xff] }
 0x178   : > { %v545_v59 = vpop.f32.mrf.mxu0 }
 0x179   : > { %v2166_v15 = vadd.f32 %v2036_v32, %v545_v59  ;;  %v581_v59 = vld [vmem:[%s1978_s25 + $0x90] sm:$0xff] }
 0x180   : > { %v548_v60 = vpop.f32.mrf.mxu0 }
 0x181   : > { %v2161_v14 = vadd.f32 %v2036_v32, %v548_v60  ;;  %v576_v60 = vld [vmem:[%s1978_s25 + $0x68] sm:$0xff] }
 0x183   : > { %2647 = vst [vmem:[#allocation8_spill] sm:$0xff] %v2161_v14 }
 0x188   : > { %v550_v62 = vpop.f32.mrf.mxu0 }
 0x189   : > { %v2155_v12 = vadd.f32 %v2036_v32, %v550_v62  ;;  %v578_v62 = vld [vmem:[%s1978_s25 + $0x78] sm:$0xff] }
 0x190   : > { %v553_v0 = vpop.f32.mrf.mxu0 }
 0x191   : > { %v2150_v11 = vadd.f32 %v2036_v32, %v553_v0  ;;  %v580_v0 = vld [vmem:[%s1978_s25 + $0x88] sm:$0xff] }
 0x198   : > { %v555_v2 = vpop.f32.mrf.mxu0 }
 0x199   : > { %v2145_v10 = vadd.f32 %v2036_v32, %v555_v2  ;;  %v582_v2 = vld [vmem:[%s1978_s25 + $0x98] sm:$0xff] }
 0x1a0   : > { %v558_v4 = vpop.f32.mrf.mxu0 }
 0x1a1   : > { %v2140_v9 = vadd.f32 %v2036_v32, %v558_v4  ;;  %v584_v4 = vld [vmem:[%s1978_s25 + $0xa8] sm:$0xff] }
 0x1a8   : > { %v560_v6 = vpop.f32.mrf.mxu0 }
 0x1a9   : > { %v2136_v7 = vadd.f32 %v2036_v32, %v560_v6  ;;  %v573_v32 = vld [vmem:[%s1978_s25 + $0x50] sm:$0xff]  ;;  %v586_v6 = vld [vmem:[%s1978_s25 + $0xb8] sm:$0xff] }
 0x1aa   : > { %658 = vmatmul.f32.gmra.mxu1 %v573_v32  ;;  %v594_v32 = vld [vmem:[%s1978_s25 + $0xf8] sm:$0xff] }
 0x1ab   : > { %740 = vmatpush.msra.mxu2 %v2136_v7  ;;  %1619 = vmatpush.msrb.mxu3 %v2136_v7 }
 0x1ad   : > { %741 = vmatpush.msra.mxu2 %v2140_v9  ;;  %1620 = vmatpush.msrb.mxu3 %v2140_v9 }
 0x1af   : > { %742 = vmatpush.msra.mxu2 %v2145_v10  ;;  %1621 = vmatpush.msrb.mxu3 %v2145_v10 }
 0x1b1   : > { %743 = vmatpush.msra.mxu2 %v2150_v11  ;;  %1622 = vmatpush.msrb.mxu3 %v2150_v11 }
 0x1b2   : > { %661 = vmatmul.f32.gmra.mxu1 %v575_v43  ;;  %v596_v43 = vld [vmem:[%s1978_s25 + $0x108] sm:$0xff] }
 0x1b3   : > { %744 = vmatpush.msra.mxu2 %v2155_v12  ;;  %1623 = vmatpush.msrb.mxu3 %v2155_v12 }
 0x1b5   : > { %745 = vmatpush.msra.mxu2 %v2161_v14  ;;  %1624 = vmatpush.msrb.mxu3 %v2161_v14 }
 0x1b7   : > { %746 = vmatpush.msra.mxu2 %v2166_v15  ;;  %1625 = vmatpush.msrb.mxu3 %v2166_v15 }
 0x1b9   : > { %747 = vmatpush.msra.mxu2 %v2171_v16  ;;  %1626 = vmatpush.msrb.mxu3 %v2171_v16 }
 0x1ba   : > { %664 = vmatmul.f32.gmra.mxu1 %v577_v54 }
 0x1bb   : > { %748 = vmatpush.msra.mxu2 %v2176_v17  ;;  %1627 = vmatpush.msrb.mxu3 %v2176_v17 }
 0x1bd   : > { %749 = vmatpush.msra.mxu2 %v2182_v19  ;;  %1628 = vmatpush.msrb.mxu3 %v2182_v19 }
 0x1bf   : > { %750 = vmatpush.msra.mxu2 %v2187_v20  ;;  %1629 = vmatpush.msrb.mxu3 %v2187_v20 }
 0x1c1   : > { %751 = vmatpush.msra.mxu2 %v2192_v21  ;;  %1630 = vmatpush.msrb.mxu3 %v2192_v21 }
 0x1c2   : > { %667 = vmatmul.f32.gmra.mxu1 %v579_v57  ;;  %v603_v57 = vld [vmem:[%s1978_s25 + $0x140] sm:$0xff] }
 0x1c3   : > { %752 = vmatpush.msra.mxu2 %v2198_v22  ;;  %1631 = vmatpush.msrb.mxu3 %v2198_v22 }
 0x1c5   : > { %753 = vmatpush.msra.mxu2 %v2205_v24  ;;  %1632 = vmatpush.msrb.mxu3 %v2205_v24 }
 0x1c7   : > { %754 = vmatpush.msra.mxu2 %v2211_v25  ;;  %1633 = vmatpush.msrb.mxu3 %v2211_v25  ;;  %v644_v18 = vpop.f32.mrf.mxu1 }
 0x1c9   : > { %755 = vmatpush.msra.mxu2 %v2217_v26  ;;  %1634 = vmatpush.msrb.mxu3 %v2217_v26 }
 0x1ca   : > { %756 = vmatmul.f32.vlgmr.msra.gmra.mxu2 %v564_v27  ;;  %837 = vmatmul.f32.vlgmr.msrb.gmra.mxu3 %v618_v28  ;;  %v595_v27 = vld [vmem:[%s1978_s25 + $0x100] sm:$0xff] }
 0x1cb   : > { %670 = vmatmul.f32.gmra.mxu1 %v581_v59 }
 0x1cf   : > { %v647_v28 = vpop.f32.mrf.mxu1 }
 0x1d2   : > { %759 = vmatmul.f32.gmra.mxu2 %v566_v30  ;;  %840 = vmatmul.f32.gmra.mxu3 %v620_v31  ;;  %v597_v30 = vld [vmem:[%s1978_s25 + $0x110] sm:$0xff] }
 0x1d3   : > { %673 = vmatmul.f32.gmra.mxu1 %v583_v61  ;;  %v600_v61 = vld [vmem:[%s1978_s25 + $0x128] sm:$0xff] }
 0x1d7   : > { %v650_v31 = vpop.f32.mrf.mxu1 }
 0x1da   : > { %762 = vmatmul.f32.gmra.mxu2 %v568_v33  ;;  %843 = vmatmul.f32.gmra.mxu3 %v622_v38  ;;  %v599_v33 = vld [vmem:[%s1978_s25 + $0x120] sm:$0xff] }
 0x1db   : > { %676 = vmatmul.f32.gmra.mxu1 %v585_v63 }
 0x1df   : > { %v653_v38 = vpop.f32.mrf.mxu1 }
 0x1e2   : > { %765 = vmatmul.f32.gmra.mxu2 %v570_v48  ;;  %846 = vmatmul.f32.gmra.mxu3 %v624_v53  ;;  %v601_v48 = vld [vmem:[%s1978_s25 + $0x130] sm:$0xff] }
 0x1e3   : > { %679 = vmatmul.f32.gmra.mxu1 %v587_v1 }
 0x1e7   : > { %v656_v53 = vpop.f32.mrf.mxu1 }
 0x1ea   : > { %768 = vmatmul.f32.gmra.mxu2 %v572_v55  ;;  %849 = vmatmul.f32.gmra.mxu3 %v626_v56  ;;  %v598_v56 = vld [vmem:[%s1978_s25 + $0x118] sm:$0xff] }
 0x1eb   : > { %682 = vmatmul.f32.gmra.mxu1 %v589_v3  ;;  %v607_v3 = vld [vmem:[%s1978_s25 + $0x160] sm:$0xff] }
 0x1f2   : > { %771 = vmatmul.f32.gmra.mxu2 %v574_v58 }
 0x1f3   : > { %685 = vmatmul.f32.gmra.mxu1 %v591_v5 }
 0x1fa   : > { %774 = vmatmul.f32.gmra.mxu2 %v576_v60 }
 0x1fb   : > { %688 = vmatmul.f32.gmra.mxu1 %v593_v8  ;;  %v604_v8 = vld [vmem:[%s1978_s25 + $0x148] sm:$0xff] }
 0x202   : > { %777 = vmatmul.f32.gmra.mxu2 %v578_v62  ;;  %v605_v62 = vld [vmem:[%s1978_s25 + $0x150] sm:$0xff] }
 0x203   : > { %691 = vmatmul.f32.gmra.mxu1 %v595_v27 }
 0x20a   : > { %780 = vmatmul.f32.gmra.mxu2 %v580_v0 }
 0x20b   : > { %694 = vmatmul.f32.gmra.mxu1 %v597_v30 }
 0x212   : > { %783 = vmatmul.f32.gmra.mxu2 %v582_v2  ;;  %v602_v2 = vld [vmem:[%s1978_s25 + $0x138] sm:$0xff] }
 0x213   : > { %697 = vmatmul.f32.gmra.mxu1 %v599_v33  ;;  %v608_v33 = vld [vmem:[%s1978_s25 + $0x168] sm:$0xff] }
 0x21a   : > { %786 = vmatmul.f32.gmra.mxu2 %v584_v4 }
 0x21b   : > { %700 = vmatmul.f32.gmra.mxu1 %v601_v48 }
 0x222   : > { %789 = vmatmul.f32.gmra.mxu2 %v586_v6 }
 0x223   : > { %703 = vmatmul.f32.gmra.mxu1 %v603_v57  ;;  %v615_v57 = vld [vmem:[%s1978_s25 + $0x1a0] sm:$0xff] }
 0x227   : > { %v659_v60 = vpop.f32.mrf.mxu1 }
 0x22a   : > { %792 = vmatmul.f32.gmra.mxu2 %v588_v13  ;;  %v609_v13 = vld [vmem:[%s1978_s25 + $0x170] sm:$0xff] }
 0x22b   : > { %706 = vmatmul.f32.gmra.mxu1 %v605_v62 }
 0x22f   : > { %v662_v1 = vpop.f32.mrf.mxu1 }
 0x232   : > { %795 = vmatmul.f32.gmra.mxu2 %v590_v23 }
 0x233   : > { %709 = vmatmul.f32.gmra.mxu1 %v607_v3 }
 0x237   : > { %v665_v6 = vpop.f32.mrf.mxu1 }
 0x23a   : > { %798 = vmatmul.f32.gmra.mxu2 %v592_v29  ;;  %v611_v29 = vld [vmem:[%s1978_s25 + $0x180] sm:$0xff] }
 0x23b   : > { %712 = vmatmul.f32.gmra.mxu1 %v609_v13 }
 0x23f   : > { %v668_v27 = vpop.f32.mrf.mxu1 }
 0x242   : > { %801 = vmatmul.f32.gmra.mxu2 %v594_v32 }
 0x243   : > { %715 = vmatmul.f32.gmra.mxu1 %v611_v29 }
 0x248   : > { %v671_v32 = vpop.f32.mrf.mxu1 }
 0x24a   : > { %804 = vmatmul.f32.gmra.mxu2 %v596_v43  ;;  %v2285_v43 = vpop.f32.mrf.mxu3 }
 0x24d   : > { %v757_v54 = vpop.f32.mrf.mxu2 }
 0x24e   : > { %v2261_v55 = vadd.f32 %v757_v54, %v644_v18 }
 0x250   : > { %v674_v54 = vpop.f32.mrf.mxu1 }
 0x252   : > { %807 = vmatmul.f32.gmra.mxu2 %v598_v56  ;;  %v610_v56 = vld [vmem:[%s1978_s25 + $0x178] sm:$0xff] }
 0x255   : > { %v760_v58 = vpop.f32.mrf.mxu2 }
 0x256   : > { %v2265_v59 = vadd.f32 %v760_v58, %v647_v28  ;;  %v606_v28 = vld [vmem:[%s1978_s25 + $0x158] sm:$0xff] }
 0x258   : > { %v677_v62 = vpop.f32.mrf.mxu1 }
 0x25a   : > { %810 = vmatmul.f32.gmra.mxu2 %v600_v61 }
 0x25d   : > { %v763_v63 = vpop.f32.mrf.mxu2 }
 0x25e   : > { %v2269_v0 = vadd.f32 %v763_v63, %v650_v31  ;;  %v612_v63 = vld [vmem:[%s1978_s25 + $0x188] sm:$0xff] }
 0x262   : > { %813 = vmatmul.f32.gmra.mxu2 %v602_v2 }
 0x265   : > { %v766_v4 = vpop.f32.mrf.mxu2 }
 0x266   : > { %v2273_v5 = vadd.f32 %v766_v4, %v653_v38  ;;  %v613_v38 = vld [vmem:[%s1978_s25 + $0x190] sm:$0xff]  ;;  %v614_v4 = vld [vmem:[%s1978_s25 + $0x198] sm:$0xff] }
 0x267   : > { %718 = vmatmul.f32.gmra.mxu1 %v613_v38 }
 0x26a   : > { %816 = vmatmul.f32.gmra.mxu2 %v604_v8  ;;  %v680_v8 = vpop.f32.mrf.mxu1 }
 0x26d   : > { %v769_v18 = vpop.f32.mrf.mxu2 }
 0x26e   : > { %v2277_v23 = vadd.f32 %v769_v18, %v656_v53  ;;  %v616_v18 = vld [vmem:[%s1978_s25 + $0x1a8] sm:$0xff]  ;;  %s1282_s25 = sshll.u32 %s260_s23, 4  ;;  %s1283_s25 = int_to_ptr.vmem [resolvable:$true] %s1282_s25 }
 0x26f   : > { %721 = vmatmul.f32.gmra.mxu1 %v615_v57 }
 0x272   : > { %819 = vmatmul.f32.gmra.mxu2 %v606_v28  ;;  %v683_v28 = vpop.f32.mrf.mxu1 }
 0x275   : > { %v772_v30 = vpop.f32.mrf.mxu2 }
 0x276   : > { %v2281_v31 = vadd.f32 %v772_v30, %v659_v60  ;;  %v2291_v60 = vpop.f32.mrf.mxu3 }
 0x27a   : > { %822 = vmatmul.f32.gmra.mxu2 %v608_v33  ;;  %v686_v33 = vpop.f32.mrf.mxu1 }
 0x27d   : > { %v775_v48 = vpop.f32.mrf.mxu2 }
 0x27e   : > { %v2287_v53 = vadd.f32 %v775_v48, %v662_v1  ;;  %v2295_v13 = vpop.f32.mrf.mxu3 }
 0x282   : > { %825 = vmatmul.f32.gmra.mxu2 %v610_v56  ;;  %v689_v56 = vpop.f32.mrf.mxu1 }
 0x285   : > { %v778_v58 = vpop.f32.mrf.mxu2 }
 0x286   : > { %v779_v61 = vadd.f32 %v778_v58, %v665_v6  ;;  %v2298_v29 = vpop.f32.mrf.mxu3 }
 0x28a   : > { %828 = vmatmul.f32.gmra.mxu2 %v612_v63  ;;  %v692_v58 = vpop.f32.mrf.mxu1 }
 0x28d   : > { %v781_v2 = vpop.f32.mrf.mxu2 }
 0x28e   : > { %v782_v3 = vadd.f32 %v781_v2, %v668_v27  ;;  %v2300_v38 = vpop.f32.mrf.mxu3 }
 0x292   : > { %831 = vmatmul.f32.gmra.mxu2 %v614_v4  ;;  %v695_v22 = vpop.f32.mrf.mxu1 }
 0x295   : > { %v784_v1 = vpop.f32.mrf.mxu2 }
 0x296   : > { %v838_v57 = vpop.f32.mrf.mxu3 }
 0x29a   : > { %834 = vmatmul.f32.gmra.mxu2 %v616_v18 }
 0x29d   : > { %v787_v30 = vpop.f32.mrf.mxu2 }
 0x29e   : > { %v2302_v63 = vpop.f32.mrf.mxu3  ;;  %v788_v20 = vadd.f32 %v787_v30, %v674_v54 }
 0x2a5   : > { %v790_v6 = vpop.f32.mrf.mxu2 }
 0x2a6   : > { %v2310_v21 = vpop.f32.mrf.mxu3  ;;  %v791_v14 = vadd.f32 %v790_v6, %v677_v62 }
 0x2ad   : > { %v793_v48 = vpop.f32.mrf.mxu2 }
 0x2ae   : > { %v794_v25 = vadd.f32 %v793_v48, %v680_v8  ;;  %v785_v8 = vadd.f32 %v784_v1, %v671_v32  ;;  %v2330_v32 = vadd.f32 %v782_v3, %v2074_v42  ;;  %v2343_v42 = vadd.f32 %v2287_v53, %v2086_v45 }
 0x2af   : > { %v2356_v45 = vadd.f32 %v2277_v23, %v2096_v47  ;;  %v2370_v23 = vadd.f32 %v2265_v59, %v2116_v51 }
 0x2b0   : > { %v2313_v19 = vadd.f32 %v794_v25, %v2052_v37  ;;  %v2326_v25 = vadd.f32 %v785_v8, %v2069_v41  ;;  %v925_v3 = vmin.f32 %v2330_v32, 0.0  ;;  %v923_v53 = vmin.f32 %v2343_v42, 0.0 }
 0x2b1   : > { %vm893_vm8 = vcmp.gt.f32.partialorder %v2330_v32, 0.0  ;;  %vm891_vm10 = vcmp.gt.f32.partialorder %v2343_v42, 0.0  ;;  %vm889_vm12 = vcmp.gt.f32.partialorder %v2356_v45, 0.0  ;;  %vm886_vm15 = vcmp.gt.f32.partialorder %v2370_v23, 0.0 }
 0x2b2   : > { %v929_v48 = vmin.f32 %v2313_v19, 0.0  ;;  %v926_v41 = vmin.f32 %v2326_v25, 0.0  ;;  %vm897_vm4 = vcmp.gt.f32.partialorder %v2313_v19, 0.0  ;;  %vm894_vm7 = vcmp.gt.f32.partialorder %v2326_v25, 0.0 }
 0x2b5   : > { %v796_v27 = vpop.f32.mrf.mxu2 }
 0x2b6   : > { %v797_v2 = vadd.f32 %v796_v27, %v683_v28 }
 0x2b8   : > { %v2308_v18 = vadd.f32 %v797_v2, %v2047_v36  ;;  %v2321_v36 = vadd.f32 %v788_v20, %v2064_v40  ;;  %v973_v20 = vmul.f32 1.442695, %v929_v48 }
 0x2ba   : > { %v930_v28 = vmin.f32 %v2308_v18, 0.0  ;;  %v927_v40 = vmin.f32 %v2321_v36, 0.0  ;;  %vm898_vm3 = vcmp.gt.f32.partialorder %v2308_v18, 0.0  ;;  %vm895_vm6 = vcmp.gt.f32.partialorder %v2321_v36, 0.0 }
 0x2bc   : > { %v975_v37 = vmul.f32 1.442695, %v930_v28  ;;  %v969_v2 = vmul.f32 1.442695, %v927_v40  ;;  %v967_v28 = vmul.f32 1.442695, %v926_v41 }
 0x2bd   : > { %v799_v4 = vpop.f32.mrf.mxu2 }
 0x2be   : > { %v800_v26 = vadd.f32 %v799_v4, %v686_v33 }
 0x2c0   : > { %v2305_v24 = vadd.f32 %v800_v26, %v2042_v35  ;;  %v2318_v35 = vadd.f32 %v791_v14, %v2059_v39  ;;  %v2332_v39 = vpop.f32.mrf.mxu1  ;;  %v847_v14 = vpop.f32.mrf.mxu3 }
 0x2c2   : > { %v931_v17 = vmin.f32 %v2305_v24, 0.0  ;;  %v928_v30 = vmin.f32 %v2318_v35, 0.0  ;;  %vm899_vm2 = vcmp.gt.f32.partialorder %v2305_v24, 0.0  ;;  %vm896_vm5 = vcmp.gt.f32.partialorder %v2318_v35, 0.0 }
 0x2c4   : > { %v977_v62 = vmul.f32 1.442695, %v931_v17 }
 0x2c5   : > { %v802_v33 = vpop.f32.mrf.mxu2 }
 0x2c6   : > { %v803_v26 = vadd.f32 %v802_v33, %v689_v56  ;;  %1688 = vpow2.f32 %v977_v62  ;;  %v971_v56 = vmul.f32 1.442695, %v928_v30 }
 0x2c7   : > { %1690 = vpow2.f32 %v975_v37 }
 0x2c8   : > { %v868_v54 = vadd.f32 %v803_v26, %v2039_v34  ;;  %v2336_v34 = vadd.f32 %v779_v61, %v2081_v44  ;;  %v2348_v44 = vadd.f32 %v2281_v31, %v2091_v46  ;;  %v965_v26 = vmul.f32 1.442695, %v925_v3  ;;  %v850_v30 = vpop.f32.mrf.mxu3 }
 0x2c9   : > { %v2361_v46 = vadd.f32 %v2273_v5, %v2104_v49  ;;  %v2374_v49 = vadd.f32 %v2269_v0, %v2110_v50  ;;  %v851_v51 = vadd.f32 %v850_v30, %v2300_v38  ;;  %v848_v3 = vadd.f32 %v847_v14, %v2298_v29 }
 0x2ca   : > { %v932_v6 = vmin.f32 %v868_v54, 0.0  ;;  %v924_v4 = vmin.f32 %v2336_v34, 0.0  ;;  %v922_v31 = vmin.f32 %v2348_v44, 0.0  ;;  %vm900_vm1 = vcmp.gt.f32.partialorder %v868_v54, 0.0 }
 0x2cb   : > { %v919_v38 = vmin.f32 %v2374_v49, 0.0  ;;  %vm892_vm9 = vcmp.gt.f32.partialorder %v2336_v34, 0.0  ;;  %vm890_vm11 = vcmp.gt.f32.partialorder %v2348_v44, 0.0  ;;  %vm888_vm13 = vcmp.gt.f32.partialorder %v2361_v46, 0.0 }
 0x2cc   : > { %v979_v1 = vmul.f32 1.442695, %v932_v6  ;;  %v1689_v61 = vpop.eup %1688  ;;  %v963_v6 = vmul.f32 1.442695, %v924_v4  ;;  %v959_v41 = vmul.f32 1.442695, %v922_v31  ;;  %v2394_v4 = vadd.f32 %v851_v51, %v2136_v7 }
 0x2cd   : > { %v805_v17 = vpop.f32.mrf.mxu2  ;;  %v1691_v33 = vpop.eup %1690  ;;  %v1479_v37 = vadd.f32 -1.0, %v1689_v61  ;;  %v845_v61 = vadd.f32 %v2310_v21, %v2295_v13  ;;  %v2404_v21 = vadd.f32 %v848_v3, %v2140_v9  ;;  %vm887_vm14 = vcmp.gt.f32.partialorder %v2374_v49, 0.0 }
 0x2ce   : > { %1692 = vpow2.f32 %v979_v1  ;;  %v2339_v27 = vadd.f32 %v805_v17, %v692_v58  ;;  %v2352_v58 = vadd.f32 %v838_v57, %v2285_v43  ;;  %v2364_v43 = vpop.f32.mrf.mxu1  ;;  %v1478_v40 = vadd.f32 -1.0, %v1691_v33 }
 0x2cf   : > { %1694 = vpow2.f32 %v973_v20  ;;  %v921_v1 = vmin.f32 %v2356_v45, 0.0  ;;  %v961_v17 = vmul.f32 1.442695, %v923_v53  ;;  %v1059_v59 = vsel %vm899_vm2, %v2305_v24, %v1479_v37 }
 0x2d0   : > { %1696 = vpow2.f32 %v971_v56  ;;  %v918_v56 = vmin.f32 %v2370_v23, 0.0  ;;  %v842_v53 = vadd.f32 %v2302_v63, %v2291_v60  ;;  %v948_v60 = vmin.f32 %v2394_v4, 0.0 }
 0x2d1   : > { %1698 = vpow2.f32 %v969_v2  ;;  %v957_v24 = vmul.f32 1.442695, %v921_v1  ;;  %vm915_vm2 = vcmp.gt.f32.partialorder %v2404_v21, 0.0 }
 0x2d2   : > { %1700 = vpow2.f32 %v967_v28  ;;  %v2418_v37 = vadd.f32 %v842_v53, %v2150_v11 }
 0x2d3   : > { %1702 = vpow2.f32 %v965_v26 }
 0x2d4   : > { %v1693_v8 = vpop.eup %1692  ;;  %1704 = vpow2.f32 %v963_v6 }
 0x2d5   : > { %v808_v48 = vpop.f32.mrf.mxu2  ;;  %v1480_v62 = vadd.f32 -1.0, %v1693_v8  ;;  %v1695_v57 = vpop.eup %1694  ;;  %1706 = vpow2.f32 %v961_v17 }
 0x2d6   : > { %v2366_v47 = vadd.f32 %v808_v48, %v695_v22  ;;  %v1697_v20 = vpop.eup %1696  ;;  %v2380_v22 = vadd.f32 %v2261_v55, %v2122_v52  ;;  %v1477_v50 = vadd.f32 -1.0, %v1695_v57  ;;  %v1058_v52 = vsel %vm898_vm3, %v2308_v18, %v1478_v40 }
 0x2d7   : > { %v1060_v5 = vsel %vm900_vm1, %v868_v54, %v1480_v62  ;;  %v1699_v0 = vpop.eup %1698  ;;  %v920_v54 = vmin.f32 %v2361_v46, 0.0  ;;  %v1476_v55 = vadd.f32 -1.0, %v1697_v20  ;;  %1708 = vpow2.f32 %v959_v41 }
 0x2d8   : > { %1081 = vmatpush.msra.mxu3 %v1060_v5  ;;  %v1701_v2 = vpop.eup %1700  ;;  %v1057_v29 = vsel %vm897_vm4, %v2313_v19, %v1477_v50  ;;  %v1475_v14 = vadd.f32 -1.0, %v1699_v0  ;;  %v2407_v19 = vpop.f32.mrf.mxu1  ;;  %v917_v31 = vmin.f32 %v2380_v22, 0.0  ;;  %1710 = vpow2.f32 %v957_v24 }
 0x2d9   : > { %v1703_v18 = vpop.eup %1702  ;;  %v955_v33 = vmul.f32 1.442695, %v920_v54  ;;  %v1056_v7 = vsel %vm896_vm5, %v2318_v35, %v1476_v55  ;;  %v1474_v13 = vadd.f32 -1.0, %v1701_v2  ;;  %v2412_v48 = vadd.f32 %v845_v61, %v2145_v10 }
 0x2da   : > { %1082 = vmatpush.msra.mxu3 %v1059_v59  ;;  %v1705_v26 = vpop.eup %1704  ;;  %v1055_v9 = vsel %vm895_vm6, %v2321_v36, %v1475_v14  ;;  %v1473_v63 = vadd.f32 -1.0, %v1703_v18  ;;  %v951_v62 = vmul.f32 1.442695, %v918_v56  ;;  %v947_v57 = vmin.f32 %v2404_v21, 0.0 }
 0x2db   : > { %v1707_v35 = vpop.eup %1706  ;;  %1712 = vpow2.f32 %v955_v33  ;;  %v1054_v30 = vsel %vm894_vm7, %v2326_v25, %v1474_v13  ;;  %v1472_v10 = vadd.f32 -1.0, %v1705_v26  ;;  %v2424_v5 = vadd.f32 %v2352_v58, %v2155_v12 }
 0x2dc   : > { %1083 = vmatpush.msra.mxu3 %v1058_v52  ;;  %v949_v36 = vmul.f32 1.442695, %v917_v31  ;;  %v946_v40 = vmin.f32 %v2412_v48, 0.0  ;;  %v1011_v20 = vmul.f32 1.442695, %v948_v60  ;;  %v1053_v1 = vsel %vm893_vm8, %v2330_v32, %v1473_v63 }
 0x2dd   : > { %v811_v28 = vpop.f32.mrf.mxu2  ;;  %v1709_v6 = vpop.eup %1708  ;;  %v1471_v17 = vadd.f32 -1.0, %v1707_v35  ;;  %v945_v12 = vmin.f32 %v2418_v37, 0.0  ;;  %v1009_v58 = vmul.f32 1.442695, %v947_v57  ;;  %v1052_v59 = vsel %vm892_vm9, %v2336_v34, %v1472_v10 }
 0x2de   : > { %v2398_v8 = vadd.f32 %v811_v28, %v2332_v39  ;;  %1084 = vmatpush.msra.mxu3 %v1057_v29  ;;  %v953_v39 = vmul.f32 1.442695, %v919_v38  ;;  %v1711_v51 = vpop.eup %1710  ;;  %v1470_v50 = vadd.f32 -1.0, %v1709_v6  ;;  %v944_v54 = vmin.f32 %v2424_v5, 0.0 }
 0x2df   : > { %v1007_v32 = vmul.f32 1.442695, %v946_v40  ;;  %v1469_v41 = vadd.f32 -1.0, %v1711_v51  ;;  %v1005_v34 = vmul.f32 1.442695, %v945_v12  ;;  %vm885_vm0 = vcmp.gt.f32.partialorder %v2380_v22, 0.0 }
 0x2e0   : > { %1085 = vmatpush.msra.mxu3 %v1056_v7  ;;  %1714 = vpow2.f32 %v953_v39  ;;  %v2438_v56 = vpop.f32.mrf.mxu1  ;;  %v1050_v52 = vsel %vm890_vm11, %v2348_v44, %v1470_v50  ;;  %v1003_v38 = vmul.f32 1.442695, %v944_v54  ;;  %vm916_vm1 = vcmp.gt.f32.partialorder %v2394_v4, 0.0  ;;  %v1079_v54 = vld [vmem:[%s2629_s2 + $0x10] sm:$0xff] }
 0x2e1   : > { %1716 = vpow2.f32 %v951_v62  ;;  %v1713_v0 = vpop.eup %1712  ;;  %vm914_vm3 = vcmp.gt.f32.partialorder %v2412_v48, 0.0  ;;  %vm913_vm4 = vcmp.gt.f32.partialorder %v2418_v37, 0.0  ;;  %vm912_vm5 = vcmp.gt.f32.partialorder %v2424_v5, 0.0 }
 0x2e2   : > { %1086 = vmatpush.msra.mxu3 %v1055_v9  ;;  %1718 = vpow2.f32 %v949_v36  ;;  %v1468_v55 = vadd.f32 -1.0, %v1713_v0 }
 0x2e3   : > { %1720 = vpow2.f32 %v1011_v20 }
 0x2e4   : > { %1087 = vmatpush.msra.mxu3 %v1054_v30  ;;  %1722 = vpow2.f32 %v1009_v58  ;;  %v1048_v44 = vsel %vm888_vm13, %v2361_v46, %v1468_v55 }
 0x2e5   : > { %v814_v11 = vpop.f32.mrf.mxu2  ;;  %1724 = vpow2.f32 %v1007_v32 }
 0x2e6   : > { %v2430_v25 = vadd.f32 %v814_v11, %v2364_v43  ;;  %1088 = vmatpush.msra.mxu3 %v1053_v1  ;;  %v1051_v43 = vsel %vm891_vm10, %v2343_v42, %v1471_v17  ;;  %v1715_v3 = vpop.eup %1714  ;;  %v1049_v42 = vsel %vm889_vm12, %v2356_v45, %v1469_v41  ;;  %1726 = vpow2.f32 %v1005_v34 }
 0x2e7   : > { %v1717_v2 = vpop.eup %1716  ;;  %v1467_v61 = vadd.f32 -1.0, %v1715_v3  ;;  %1728 = vpow2.f32 %v1003_v38 }
 0x2e8   : > { %1089 = vmatpush.msra.mxu3 %v1052_v59  ;;  %v1719_v28 = vpop.eup %1718  ;;  %v1466_v14 = vadd.f32 -1.0, %v1717_v2  ;;  %v710_v26 = vpop.f32.mrf.mxu1  ;;  %v2656_v59 = vld [vmem:[#allocation9_spill] sm:$0xff]  ;;  %v2659_v2 = vld [vmem:[#allocation8_spill] sm:$0xff] }
 0x2e9   : > { %v1721_v29 = vpop.eup %1720  ;;  %v1047_v33 = vsel %vm887_vm14, %v2374_v49, %v1467_v61  ;;  %v1465_v53 = vadd.f32 -1.0, %v1719_v28  ;;  %v2660_v61 = vld [vmem:[#allocation12_spill] sm:$0xff] }
 0x2ea   : > { %1090 = vmatpush.msra.mxu3 %v1051_v43  ;;  %v1723_v18 = vpop.eup %1722  ;;  %v1496_v45 = vadd.f32 -1.0, %v1721_v29  ;;  %v1046_v13 = vsel %vm886_vm15, %v2370_v23, %v1466_v14 }
 0x2eb   : > { %v1725_v7 = vpop.eup %1724  ;;  %v1495_v46 = vadd.f32 -1.0, %v1723_v18  ;;  %v1045_v60 = vsel %vm885_vm0, %v2380_v22, %v1465_v53  ;;  %v2662_v53 = vld [vmem:[#allocation14_spill] sm:$0xff] }
 0x2ec   : > { %1091 = vmatpush.msra.mxu3 %v1050_v52  ;;  %v1727_v31 = vpop.eup %1726  ;;  %v1076_v49 = vsel %vm916_vm1, %v2394_v4, %v1496_v45  ;;  %v1494_v9 = vadd.f32 -1.0, %v1725_v7  ;;  %v2500_v45 = vadd.f32 %v2398_v8, %v2662_v53 }
 0x2ed   : > { %v2443_v24 = vpop.f32.mrf.mxu2  ;;  %v1729_v63 = vpop.eup %1728  ;;  %v1075_v23 = vsel %vm915_vm2, %v2404_v21, %v1495_v46  ;;  %v1493_v35 = vadd.f32 -1.0, %v1727_v31 }
 0x2ee   : > { %1092 = vmatpush.msra.mxu3 %v1049_v42  ;;  %v1074_v62 = vsel %vm914_vm3, %v2412_v48, %v1494_v9  ;;  %v1492_v57 = vadd.f32 -1.0, %v1729_v63  ;;  %v1077_v48 = vld [vmem:[%s2629_s2] sm:$0xff]  ;;  %v935_v8 = vmin.f32 %v2500_v45, 0.0  ;;  %vm903_vm14 = vcmp.gt.f32.partialorder %v2500_v45, 0.0 }
 0x2ef   : > { %v1073_v22 = vsel %vm913_vm4, %v2418_v37, %v1493_v35 }
 0x2f0   : > { %1093 = vmatpush.msra.mxu3 %v1048_v44  ;;  %v713_v30 = vpop.f32.mrf.mxu1  ;;  %v1072_v10 = vsel %vm912_vm5, %v2424_v5, %v1492_v57 }
 0x2f2   : > { %1094 = vmatpush.msra.mxu3 %v1047_v33 }
 0x2f4   : > { %1095 = vmatpush.msra.mxu3 %v1046_v13 }
 0x2f5   : > { %v820_v39 = vpop.f32.mrf.mxu2 }
 0x2f6   : > { %1096 = vmatpush.msra.mxu3 %v1045_v60  ;;  %v821_v58 = vadd.f32 %v820_v39, %v2438_v56  ;;  %v2658_v56 = vld [vmem:[#allocation11_spill] sm:$0xff]  ;;  %v2664_v60 = vld [vmem:[#allocation16_spill] sm:$0xff] }
 0x2f7   : > { %1097 = vmatmul.f32.vlgmr.msra.gmra.mxu3 %v1077_v48 }
 0x2f8   : > { %1104 = vmatpush.msrb.mxu3 %v1076_v49  ;;  %v716_v6 = vpop.f32.mrf.mxu1  ;;  %v2485_v34 = vadd.f32 %v821_v58, %v2658_v56  ;;  %v2510_v49 = vadd.f32 %v2339_v27, %v2664_v60  ;;  %v1580_v60 = vld [vmem:[%s2630_s3 + $0x58] sm:$0xff] }
 0x2fa   : > { %1105 = vmatpush.msrb.mxu3 %v1075_v23  ;;  %v938_v14 = vmin.f32 %v2485_v34, 0.0  ;;  %vm906_vm11 = vcmp.gt.f32.partialorder %v2485_v34, 0.0  ;;  %vm901_vm0 = vcmp.gt.f32.partialorder %v2510_v49, 0.0 }
 0x2fc   : > { %1106 = vmatpush.msrb.mxu3 %v1074_v62  ;;  %v991_v31 = vmul.f32 1.442695, %v938_v14 }
 0x2fd   : > { %v823_v4 = vpop.f32.mrf.mxu2 }
 0x2fe   : > { %1107 = vmatpush.msrb.mxu3 %v1073_v22  ;;  %v824_v5 = vadd.f32 %v823_v4, %v710_v26  ;;  %v2663_v26 = vld [vmem:[#allocation15_spill] sm:$0xff]  ;;  %v933_v4 = vmin.f32 %v2510_v49, 0.0 }
 0x2ff   : > { %1100 = vmatmul.f32.gmra.mxu3 %v1079_v54  ;;  %v2505_v46 = vadd.f32 %v2366_v47, %v2663_v26 }
 0x300   : > { %1108 = vmatpush.msrb.mxu3 %v1072_v10  ;;  %v719_v40 = vpop.f32.mrf.mxu1 }
 0x301   : > { %v934_v35 = vmin.f32 %v2505_v46, 0.0  ;;  %vm902_vm15 = vcmp.gt.f32.partialorder %v2505_v46, 0.0 }
 0x305   : > { %v826_v21 = vpop.f32.mrf.mxu2 }
 0x306   : > { %v827_v1 = vadd.f32 %v826_v21, %v713_v30  ;;  %v985_v30 = vmul.f32 1.442695, %v935_v8  ;;  %v1578_v8 = vld [vmem:[%s2630_s3 + $0x48] sm:$0xff] }
 0x308   : > { %v722_v12 = vpop.f32.mrf.mxu1  ;;  %v2473_v50 = vadd.f32 %v827_v1, %v2656_v59 }
 0x30a   : > { %v940_v52 = vmin.f32 %v2473_v50, 0.0  ;;  %vm908_vm9 = vcmp.gt.f32.partialorder %v2473_v50, 0.0 }
 0x30c   : > { %v995_v18 = vmul.f32 1.442695, %v940_v52  ;;  %v1078_v52 = vld [vmem:[%s2629_s2 + $0x8] sm:$0xff] }
 0x30d   : > { %v829_v36 = vpop.f32.mrf.mxu2 }
 0x30e   : > { %v830_v20 = vadd.f32 %v829_v36, %v716_v6  ;;  %v983_v6 = vmul.f32 1.442695, %v934_v35 }
 0x310   : > { %v2469_v51 = vadd.f32 %v830_v20, %v2171_v16  ;;  %v2657_v16 = vld [vmem:[#allocation10_spill] sm:$0xff]  ;;  %v981_v20 = vmul.f32 1.442695, %v933_v4 }
 0x311   : > { %v2482_v41 = vadd.f32 %v824_v5, %v2657_v16 }
 0x312   : > { %v941_v32 = vmin.f32 %v2469_v51, 0.0  ;;  %vm909_vm8 = vcmp.gt.f32.partialorder %v2469_v51, 0.0 }
 0x313   : > { %v939_v29 = vmin.f32 %v2482_v41, 0.0  ;;  %vm907_vm10 = vcmp.gt.f32.partialorder %v2482_v41, 0.0 }
 0x314   : > { %v997_v42 = vmul.f32 1.442695, %v941_v32 }
 0x315   : > { %v832_v11 = vpop.f32.mrf.mxu2  ;;  %v993_v13 = vmul.f32 1.442695, %v939_v29  ;;  %v1573_v29 = vld [vmem:[%s2630_s3 + $0x20] sm:$0xff] }
 0x316   : > { %v833_v37 = vadd.f32 %v832_v11, %v719_v40 }
 0x318   : > { %v878_v17 = vadd.f32 %v833_v37, %v2166_v15  ;;  %v818_v15 = vadd.f32 %v2443_v24, %v2407_v19  ;;  %v2661_v19 = vld [vmem:[#allocation13_spill] sm:$0xff] }
 0x319   : > { %v2495_v24 = vadd.f32 %v2430_v25, %v2661_v19  ;;  %v1571_v19 = vld [vmem:[%s2630_s3 + $0x10] sm:$0xff] }
 0x31a   : > { %v942_v0 = vmin.f32 %v878_v17, 0.0  ;;  %v2490_v28 = vadd.f32 %v818_v15, %v2660_v61  ;;  %vm910_vm7 = vcmp.gt.f32.partialorder %v878_v17, 0.0  ;;  %v1575_v61 = vld [vmem:[%s2630_s3 + $0x30] sm:$0xff] }
 0x31b   : > { %v936_v25 = vmin.f32 %v2495_v24, 0.0  ;;  %vm904_vm13 = vcmp.gt.f32.partialorder %v2495_v24, 0.0 }
 0x31c   : > { %v999_v55 = vmul.f32 1.442695, %v942_v0  ;;  %v937_v7 = vmin.f32 %v2490_v28, 0.0  ;;  %vm905_vm12 = vcmp.gt.f32.partialorder %v2490_v28, 0.0 }
 0x31d   : > { %v835_v43 = vpop.f32.mrf.mxu2  ;;  %v987_v62 = vmul.f32 1.442695, %v936_v25  ;;  %v1583_v25 = vld [vmem:[%s2630_s3 + $0x70] sm:$0xff] }
 0x31e   : > { %v836_v3 = vadd.f32 %v835_v43, %v722_v12  ;;  %1730 = vpow2.f32 %v999_v55  ;;  %v989_v9 = vmul.f32 1.442695, %v937_v7  ;;  %v1577_v55 = vld [vmem:[%s2630_s3 + $0x40] sm:$0xff] }
 0x31f   : > { %1732 = vpow2.f32 %v997_v42  ;;  %v1576_v42 = vld [vmem:[%s2630_s3 + $0x38] sm:$0xff] }
 0x320   : > { %v879_v38 = vadd.f32 %v836_v3, %v2659_v2 }
 0x322   : > { %v943_v44 = vmin.f32 %v879_v38, 0.0  ;;  %vm911_vm6 = vcmp.gt.f32.partialorder %v879_v38, 0.0 }
 0x324   : > { %v1001_v33 = vmul.f32 1.442695, %v943_v44  ;;  %v1731_v39 = vpop.eup %1730  ;;  %v1572_v44 = vld [vmem:[%s2630_s3 + $0x18] sm:$0xff] }
 0x325   : > { %v1733_v63 = vpop.eup %1732  ;;  %v1490_v57 = vadd.f32 -1.0, %v1731_v39  ;;  %v1581_v39 = vld [vmem:[%s2630_s3 + $0x60] sm:$0xff] }
 0x326   : > { %1734 = vpow2.f32 %v1001_v33  ;;  %v1489_v10 = vadd.f32 -1.0, %v1733_v63 }
 0x327   : > { %1736 = vpow2.f32 %v995_v18  ;;  %v1070_v36 = vsel %vm910_vm7, %v878_v17, %v1490_v57  ;;  %v1585_v18 = vld [vmem:[%s2630_s3 + $0x80] sm:$0xff] }
 0x328   : > { %1738 = vpow2.f32 %v993_v13  ;;  %v1069_v11 = vsel %vm909_vm8, %v2469_v51, %v1489_v10 }
 0x329   : > { %1740 = vpow2.f32 %v991_v31  ;;  %v1582_v31 = vld [vmem:[%s2630_s3 + $0x68] sm:$0xff] }
 0x32a   : > { %1742 = vpow2.f32 %v989_v9  ;;  %v1686_v9 = vld [vmem:[%s2631_s4 + $0x1] ss:$0 sm:$0xff] }
 0x32b   : > { %1744 = vpow2.f32 %v987_v62 }
 0x32c   : > { %v1735_v23 = vpop.eup %1734  ;;  %1746 = vpow2.f32 %v985_v30 }
 0x32d   : > { %v1491_v47 = vadd.f32 -1.0, %v1735_v23  ;;  %v1737_v22 = vpop.eup %1736  ;;  %1748 = vpow2.f32 %v983_v6 }
 0x32e   : > { %v1739_v21 = vpop.eup %1738  ;;  %v1488_v40 = vadd.f32 -1.0, %v1737_v22  ;;  %1750 = vpow2.f32 %v981_v20 }
 0x32f   : > { %v1071_v27 = vsel %vm911_vm6, %v879_v38, %v1491_v47  ;;  %v1741_v48 = vpop.eup %1740  ;;  %v1487_v37 = vadd.f32 -1.0, %v1739_v21  ;;  %v1080_v38 = vld [vmem:[%s2629_s2 + $0x18] sm:$0xff] }
 0x330   : > { %1109 = vmatpush.msrb.mxu3 %v1071_v27  ;;  %v1743_v1 = vpop.eup %1742  ;;  %v1068_v5 = vsel %vm908_vm9, %v2473_v50, %v1488_v40  ;;  %v1486_v12 = vadd.f32 -1.0, %v1741_v48  ;;  %v1687_v48 = vld [vmem:[%s2631_s4 + $0x2] ss:$0 sm:$0xff] }
 0x331   : > { %v1745_v58 = vpop.eup %1744  ;;  %v1067_v17 = vsel %vm907_vm10, %v2482_v41, %v1487_v37  ;;  %v1485_v59 = vadd.f32 -1.0, %v1743_v1 }
 0x332   : > { %1110 = vmatpush.msrb.mxu3 %v1070_v36  ;;  %v1747_v0 = vpop.eup %1746  ;;  %v1066_v51 = vsel %vm906_vm11, %v2485_v34, %v1486_v12  ;;  %v1484_v54 = vadd.f32 -1.0, %v1745_v58 }
 0x333   : > { %v1749_v32 = vpop.eup %1748  ;;  %v1065_v50 = vsel %vm905_vm12, %v2490_v28, %v1485_v59  ;;  %v1483_v43 = vadd.f32 -1.0, %v1747_v0  ;;  %v1574_v28 = vld [vmem:[%s2630_s3 + $0x28] sm:$0xff] }
 0x334   : > { %1111 = vmatpush.msrb.mxu3 %v1069_v11  ;;  %v1751_v15 = vpop.eup %1750  ;;  %v1064_v16 = vsel %vm904_vm13, %v2495_v24, %v1484_v54  ;;  %v1482_v41 = vadd.f32 -1.0, %v1749_v32  ;;  %v1570_v24 = vld [vmem:[%s2630_s3 + $0x8] sm:$0xff] }
 0x335   : > { %v1063_v3 = vsel %vm903_vm14, %v2500_v45, %v1483_v43  ;;  %v1481_v56 = vadd.f32 -1.0, %v1751_v15 }
 0x336   : > { %1112 = vmatpush.msrb.mxu3 %v1068_v5  ;;  %v1062_v34 = vsel %vm902_vm15, %v2505_v46, %v1482_v41  ;;  %v1584_v46 = vld [vmem:[%s2630_s3 + $0x78] sm:$0xff] }
 0x337   : > { %v1061_v2 = vsel %vm901_vm0, %v2510_v49, %v1481_v56  ;;  %v1579_v49 = vld [vmem:[%s2630_s3 + $0x50] sm:$0xff] }
 0x338   : > { %1113 = vmatpush.msrb.mxu3 %v1067_v17 }
 0x33a   : > { %1114 = vmatpush.msrb.mxu3 %v1066_v51 }
 0x33c   : > { %1115 = vmatpush.msrb.mxu3 %v1065_v50 }
 0x33e   : > { %1116 = vmatpush.msrb.mxu3 %v1064_v16 }
 0x340   : > { %1117 = vmatpush.msrb.mxu3 %v1063_v3 }
 0x342   : > { %1118 = vmatpush.msrb.mxu3 %v1062_v34 }
 0x344   : > { %1119 = vmatpush.msrb.mxu3 %v1061_v2 }
 0x345   : > { %1120 = vmatmul.f32.vlgmr.msrb.gmra.mxu3 %v1078_v52 }
 0x346   : > { %1177 = vmatpush.bf16.msra.mxu3 %v1577_v55 }
 0x34a   : > { %1178 = vmatpush.bf16.msra.mxu3 %v1576_v42 }
 0x34d   : > { %1123 = vmatmul.f32.gmra.mxu3 %v1080_v38 }
 0x34e   : > { %1179 = vmatpush.bf16.msra.mxu3 %v1575_v61 }
 0x352   : > { %1180 = vmatpush.bf16.msra.mxu3 %v1574_v28 }
 0x356   : > { %1181 = vmatpush.bf16.msra.mxu3 %v1573_v29 }
 0x35a   : > { %1182 = vmatpush.bf16.msra.mxu3 %v1572_v44 }
 0x35e   : > { %1183 = vmatpush.bf16.msra.mxu3 %v1571_v19 }
 0x362   : > { %1184 = vmatpush.bf16.msra.mxu3 %v1570_v24 }
 0x366   : > { %1253 = vmatpush.bf16.msrb.mxu3 %v1585_v18 }
 0x36a   : > { %1254 = vmatpush.bf16.msrb.mxu3 %v1584_v46 }
 0x36e   : > { %1255 = vmatpush.bf16.msrb.mxu3 %v1583_v25 }
 0x372   : > { %1256 = vmatpush.bf16.msrb.mxu3 %v1582_v31 }
 0x376   : > { %1257 = vmatpush.bf16.msrb.mxu3 %v1581_v39 }
 0x37a   : > { %v1098_v14 = vpop.f32.mrf.mxu3  ;;  %1258 = vmatpush.bf16.msrb.mxu3 %v1580_v60 }
 0x37e   : > { %1259 = vmatpush.bf16.msrb.mxu3 %v1579_v49 }
 0x382   : > { %v1101_v33 = vpop.f32.mrf.mxu3  ;;  %1260 = vmatpush.bf16.msrb.mxu3 %v1578_v8 }
 0x3c8   : > { %v1121_v53 = vpop.f32.mrf.mxu3 }
 0x3c9   : > { %v1122_v7 = vadd.f32 %v1121_v53, %v1098_v14 }
 0x3d0   : > { %v1124_v45 = vpop.f32.mrf.mxu3 }
 0x3d1   : > { %v1125_v13 = vadd.f32 %v1124_v45, %v1101_v33 }
 0x3d3   : > { %v1127_v26 = vpack.c.bf16 %v1125_v13, %v1122_v7 }
 0x3d5   : > { %1185 = vmatmul.bf16.vlgmr.msra.gmra.mxu3 %v1127_v26 }
 0x458   : > { %v1186_v63 = vpop.f32.mrf.mxu3 }
 0x459   : > { %v1187_v23 = vadd.f32 %v1686_v9, %v1186_v63 }
 0x45b   : > { %v1193_v35 = vmin.f32 %v1187_v23, 0.0  ;;  %vm1191_vm1 = vcmp.gt.f32.partialorder %v1187_v23, 0.0 }
 0x45d   : > { %v1195_v62 = vmul.f32 1.442695, %v1193_v35 }
 0x45f   : > { %1752 = vpow2.f32 %v1195_v62 }
 0x460   : > { %v1188_v47 = vpop.f32.mrf.mxu3 }
 0x461   : > { %v1189_v57 = vadd.f32 %v1686_v9, %v1188_v47 }
 0x463   : > { %v1194_v22 = vmin.f32 %v1189_v57, 0.0  ;;  %vm1192_vm2 = vcmp.gt.f32.partialorder %v1189_v57, 0.0 }
 0x465   : > { %v1197_v4 = vmul.f32 1.442695, %v1194_v22  ;;  %v1753_v30 = vpop.eup %1752 }
 0x466   : > { %v1529_v27 = vadd.f32 -1.0, %v1753_v30 }
 0x467   : > { %1754 = vpow2.f32 %v1197_v4 }
 0x468   : > { %v1201_v6 = vsel %vm1191_vm1, %v1187_v23, %v1529_v27 }
 0x46d   : > { %v1755_v10 = vpop.eup %1754 }
 0x46e   : > { %v1530_v21 = vadd.f32 -1.0, %v1755_v10 }
 0x470   : > { %v1202_v36 = vsel %vm1192_vm2, %v1189_v57, %v1530_v21 }
 0x471   : > { %v1203_v40 = vpack.c.bf16 %v1202_v36, %v1201_v6 }
 0x473   : > { %1261 = vmatmul.bf16.vlgmr.msrb.gmra.mxu3 %v1203_v40 }
 0x4f6   : > { %v1262_v20 = vpop.f32.mrf.mxu3 }
 0x4f7   : > { %v1263_v11 = vadd.f32 %v1687_v48, %v1262_v20 }
 0x4f9   : > { %1267 = vst [vmem:[%s260_s23] sm:$0xff] %v1263_v11 }
 0x4fe   : > { %v1264_v37 = vpop.f32.mrf.mxu3 }
 0x4ff   : > { %v1265_v1 = vadd.f32 %v1687_v48, %v1264_v37 }
 0x501   : > { %1268 = vst [vmem:[%s260_s23 + $0x8] sm:$0xff] %v1265_v1 }
 0x502   : > { %1813 = shalt.err (!%p1810_p7)
}
 0x503   : > { %s1856_s12 = smov 128   ;;  %s1857_s9 = smov 8  }
 0x504   : > { %1637 = dma.vmem_to_hbm [thread:$0]  (%p1938_p11), %s1283_s25, 256, %s1285_s13, %s1270_s15, %s1856_s12, %s1856_s12, %s1857_s9  }
 0x505 PF: > { %s1299_s10 = sand.u32 1, %s1840_s18   ;;  %p2665_p5 = scmp.ge.s32.totalorder %s1852_s21, 2 }
 0x506   : > { %s1300_s7 = scalar_lea.sflag [#allocation4], %s1299_s10 }
 0x507   : > { %p1644_p8 = pnand %p2665_p5, %p1942_p12 }
 0x509   : > { %p1645_p10 = pneg %p1644_p8 }
 0x50b   : > { %1835 = dma.done.wait (%p1645_p10), %s1300_s7, 256  }
 0x50c   : > { %1837 = vsyncadd (%p1645_p10), %s1300_s7, 4294967040  ;;  %p18_p2 = scmp.ge.s32.totalorder %s1913_s24, 4   ;;  %s2666_s18 = smov %s1844_s19 }
 0x50d   : > { %s2667_s19 = smov %s1848_s20  ;;  %s2668_s20 = smov %s1925_s27 }
 0x50e   : > { %s2669_s21 = smov %s1913_s24  ;;  %20 = sbr.rel (!%p18_p2) target bundleno = 5 (0x5), region = 88 }
 0x513   :  { %1306 = vsyncpa [#allocation3], 1 }
 0x514   :  { %1308 = vsyncpa [#allocation3 + $0x1], 1 }
 0x515   :  { %1309 = vsyncpa [#allocation4], 1 }
 0x516   :  { %1311 = vsyncpa [#allocation4 + $0x1], 1 }

</bundles_post_ra>
